<compile_context>
chip_gen: v5e
topology: v5e:2x2
jax: 0.10.0
libtpu: 0.0.40
codegen_flags: <defaults>
</compile_context>

<pallas_src>
import functools

import jax
import jax.numpy as jnp
from jax import lax
from jax.experimental import pallas as pl
from jax.experimental.pallas import tpu as pltpu

_HEAD_LANES = 128        # pad the 1-channel critic head to a full vreg lane width
_LRELU_SLOPE = 0.2


def _round_up(x, m):
    return (x + m - 1) // m * m


# ---------------------------------------------------------------------------
# Parameters: canonical flat HWIO conv weights (row order (ki, kj, cin)),
# DCGAN-style N(0, 0.02) init.
# ---------------------------------------------------------------------------
def init_params(key, input_nc=3, ndf=16, sem_c=32):
    ks = jax.random.split(key, 6)
    n = lambda k, shape: jax.random.normal(k, shape, jnp.float32) * 0.02
    p = {}
    p["w0"] = n(ks[0], (4 * 4 * input_nc, ndf));     p["b0"] = jnp.zeros((ndf,), jnp.float32)
    p["w1"] = n(ks[1], (4 * 4 * ndf, 2 * ndf));      p["b1"] = jnp.zeros((2 * ndf,), jnp.float32)
    p["w2"] = n(ks[2], (4 * 4 * 2 * ndf, 4 * ndf));  p["b2"] = jnp.zeros((4 * ndf,), jnp.float32)
    p["w3"] = n(ks[3], (3 * 3 * 4 * ndf, 1));        p["b3"] = jnp.zeros((1,), jnp.float32)
    p["wg"] = n(ks[4], (sem_c, 2 * ndf));            p["bg"] = jnp.zeros((2 * ndf,), jnp.float32)
    p["wb"] = n(ks[5], (sem_c, 2 * ndf));            p["bb"] = jnp.zeros((2 * ndf,), jnp.float32)
    return p


def prepare_params(params):
    """One-time weight repacking (hoisted out of the forward pass)."""
    k2cin, ndf = params["w0"].shape
    cin = k2cin // 16
    ndf2 = params["w1"].shape[1]
    ndf4 = params["w2"].shape[1]

    def taps_s2(w_flat, c_in, c_out):
        # [4*4*Cin, N] (ki,kj,c rows) -> [4 taps (dp,dq), 4*Cin (di,dj,c), N] bf16
        w = w_flat.reshape(2, 2, 2, 2, c_in, c_out)   # (dp, di, dq, dj, c, n)
        w = w.transpose(0, 2, 1, 3, 4, 5)             # (dp, dq, di, dj, c, n)
        return w.reshape(4, 4 * c_in, c_out).astype(jnp.bfloat16)

    w3 = jnp.pad(params["w3"], ((0, 0), (0, _HEAD_LANES - 1)))
    pp = {
        "w0": taps_s2(params["w0"], cin, ndf),
        "w1": taps_s2(params["w1"], ndf, ndf2),
        "w2": taps_s2(params["w2"], ndf2, ndf4),
        "w3": w3.reshape(9, ndf4, _HEAD_LANES).astype(jnp.bfloat16),
        "b0": params["b0"].reshape(1, -1).astype(jnp.float32),
        "b1": params["b1"].reshape(1, -1).astype(jnp.float32),
        "b2": params["b2"].reshape(1, -1).astype(jnp.float32),
        "b3": jnp.pad(params["b3"], (0, _HEAD_LANES - 1)).reshape(1, -1).astype(jnp.float32),
        "wg": params["wg"].astype(jnp.bfloat16),
        "bg": params["bg"].reshape(1, -1).astype(jnp.float32),
        "wb": params["wb"].astype(jnp.bfloat16),
        "bb": params["bb"].reshape(1, -1).astype(jnp.float32),
    }
    return pp


# ---------------------------------------------------------------------------
# Fused Pallas kernel: one grid step == one batch element, whole critic.
# ---------------------------------------------------------------------------
def _fused_disc_kernel(*refs, cfg, use_sft, slope):
    if use_sft:
        (x_ref, sem_ref,
         w0_ref, b0_ref, w1_ref, b1_ref,
         wg_ref, bg_ref, wb_ref, bb_ref,
         w2_ref, b2_ref, w3_ref, b3_ref,
         out_ref, slab1, slab2, slab3) = refs
    else:
        (x_ref,
         w0_ref, b0_ref, w1_ref, b1_ref,
         w2_ref, b2_ref, w3_ref, b3_ref,
         out_ref, slab1, slab2, slab3) = refs

    f32, bf16 = jnp.float32, jnp.bfloat16

    Ws0, mp0, Ho0, Wo0 = cfg["Ws0"], cfg["mp0"], cfg["Ho0"], cfg["Wo0"]
    Ws1, mp1, Ho1, Wo1, C1 = cfg["Ws1"], cfg["mp1"], cfg["Ho1"], cfg["Wo1"], cfg["C1"]
    Ws2, mp2, Ho2, Wo2, C2 = cfg["Ws2"], cfg["mp2"], cfg["Ho2"], cfg["Wo2"], cfg["C2"]
    Wp3, mp3 = cfg["Wp3"], cfg["mp3"]

    # Scratch persists across grid steps: re-zero so the padded borders of the
    # intermediate slabs are correct for this batch element.
    slab1[...] = jnp.zeros_like(slab1)
    slab2[...] = jnp.zeros_like(slab2)
    slab3[...] = jnp.zeros_like(slab3)

    def tap_matmul(read, offsets, mp, w_ref, b_ref):
        n = w_ref.shape[-1]
        acc = jnp.zeros((mp, n), f32)
        for t, off in enumerate(offsets):
            acc = acc + jnp.dot(read(off, mp), w_ref[t],
                                preferred_element_type=f32)
        return acc + b_ref[...]                       # [1, N] broadcast

    def lrelu(v):
        return jnp.maximum(v, slope * v)

    def scatter_s2d(dst, acc, Ho, Wo, Ws_src, Ws_dst, C):
        # dst cell (p, q), lane slot (di, dj) holds conv output pixel (i, j)
        # with i = 2p + di - 1, j = 2q + dj - 1 (border stays zero = padding).
        for i in range(Ho):
            p, di = (i + 1) // 2, (i + 1) % 2
            for j in range(Wo):
                q, dj = (j + 1) // 2, (j + 1) % 2
                r = p * Ws_dst + q
                lane = (di * 2 + dj) * C
                s = i * Ws_src + j
                dst[r:r + 1, lane:lane + C] = acc[s:s + 1, :]

    # --- conv0: input_nc -> ndf, k4 s2 p1, LeakyReLU -------------------------
    offs0 = (0, 1, Ws0, Ws0 + 1)
    a0 = lrelu(tap_matmul(lambda o, m: x_ref[0, o:o + m, :], offs0, mp0,
                          w0_ref, b0_ref))
    scatter_s2d(slab1, a0, Ho0, Wo0, Ws0, Ws1, C1)

    # --- conv1: ndf -> 2ndf, k4 s2 p1, SFT modulation, LeakyReLU -------------
    offs1 = (0, 1, Ws1, Ws1 + 1)
    a1 = tap_matmul(lambda o, m: slab1[o:o + m, :].astype(bf16), offs1, mp1,
                    w1_ref, b1_ref)
    if use_sft:
        s = sem_ref[0].astype(bf16)                                   # [1, sem_c]
        gamma = jnp.dot(s, wg_ref[...], preferred_element_type=f32) + bg_ref[...]
        beta = jnp.dot(s, wb_ref[...], preferred_element_type=f32) + bb_ref[...]
        a1 = a1 * (1.0 + gamma) + beta
    a1 = lrelu(a1)
    scatter_s2d(slab2, a1, Ho1, Wo1, Ws1, Ws2, C2)

    # --- conv2: 2ndf -> 4ndf, k4 s2 p1, LeakyReLU ----------------------------
    offs2 = (0, 1, Ws2, Ws2 + 1)
    a2 = lrelu(tap_matmul(lambda o, m: slab2[o:o + m, :].astype(bf16), offs2,
                          mp2, w2_ref, b2_ref))
    # interior rows of the plain padded slab for the 3x3 head (contiguous copies)
    for i in range(Ho2):
        d = (i + 1) * Wp3 + 1
        slab3[d:d + Wo2, :] = a2[i * Ws2:i * Ws2 + Wo2, :]

    # --- conv3 head: 4ndf -> 1 (lane-padded to 128), k3 s1 p1, no activation -
    offs3 = tuple(ki * Wp3 + kj for ki in range(3) for kj in range(3))
    a3 = tap_matmul(lambda o, m: slab3[o:o + m, :].astype(bf16), offs3, mp3,
                    w3_ref, b3_ref)
    out_ref[0] = a3.astype(out_ref.dtype)


# ---------------------------------------------------------------------------
# Forward pass (Discriminator.forward, which_model_netD='sed_p')
# ---------------------------------------------------------------------------
def discriminator_forward(pp, x_nchw, semantic_nchw=None, which_model_netD="sed_p"):
    x = jnp.transpose(x_nchw, (0, 2, 3, 1)).astype(jnp.float32)      # NCHW -> NHWC
    B, H, W, Cin = x.shape
    assert H % 8 == 0 and W % 8 == 0, "spatial dims must be divisible by 8"
    ndf = int(pp["b0"].shape[-1])

    use_sft = which_model_netD in {"sed_p", "sed_u"} and semantic_nchw is not None

    # ---- static layer geometry ----
    Ho0, Wo0 = H // 2, W // 2
    Hs0, Ws0 = Ho0 + 1, Wo0 + 1
    mp0 = Ho0 * Ws0
    rows0 = _round_up(max(Hs0 * Ws0, Ws0 + 1 + mp0), 8)

    Ho1, Wo1 = Ho0 // 2, Wo0 // 2
    Hs1, Ws1 = Ho1 + 1, Wo1 + 1
    mp1 = Ho1 * Ws1
    rows1 = _round_up(max(Hs1 * Ws1, Ws1 + 1 + mp1), 8)

    Ho2, Wo2 = Ho1 // 2, Wo1 // 2
    Hs2, Ws2 = Ho2 + 1, Wo2 + 1
    mp2 = Ho2 * Ws2
    rows2 = _round_up(max(Hs2 * Ws2, Ws2 + 1 + mp2), 8)

    Ho3, Wo3 = Ho2, Wo2
    Hp3, Wp3 = Ho2 + 2, Wo2 + 2
    mp3 = Ho3 * Wp3
    rows3 = _round_up(max(Hp3 * Wp3, 2 * Wp3 + 2 + mp3), 8)

    cfg = dict(Ws0=Ws0, mp0=mp0, Ho0=Ho0, Wo0=Wo0,
               Ws1=Ws1, mp1=mp1, Ho1=Ho1, Wo1=Wo1, C1=ndf,
               Ws2=Ws2, mp2=mp2, Ho2=Ho2, Wo2=Wo2, C2=2 * ndf,
               Wp3=Wp3, mp3=mp3)

    # ---- input slab: pad + space-to-depth of the raw image only (bf16) ----
    xp = jnp.pad(x, ((0, 0), (1, 1), (1, 1), (0, 0)))
    slab0 = xp.reshape(B, Hs0, 2, Ws0, 2, Cin)
    slab0 = slab0.transpose(0, 1, 3, 2, 4, 5).reshape(B, Hs0 * Ws0, 4 * Cin)
    slab0 = jnp.pad(slab0, ((0, 0), (0, rows0 - Hs0 * Ws0), (0, 0)))
    slab0 = slab0.astype(jnp.bfloat16)

    in_specs = [pl.BlockSpec((1, rows0, 4 * Cin), lambda b: (b, 0, 0))]
    args = [slab0]
    if use_sft:
        sem = jnp.transpose(semantic_nchw, (0, 2, 3, 1)).astype(jnp.float32)
        sem_pooled = jnp.mean(sem, axis=(1, 2)).reshape(B, 1, -1)    # [B, 1, sem_c]
        sem_c = sem_pooled.shape[-1]
        in_specs.append(pl.BlockSpec((1, 1, sem_c), lambda b: (b, 0, 0)))
        args.append(sem_pooled)

    def const_spec(a):
        nd = a.ndim
        return pl.BlockSpec(a.shape, lambda b, _n=nd: (0,) * _n)

    consts = [pp["w0"], pp["b0"], pp["w1"], pp["b1"]]
    if use_sft:
        consts += [pp["wg"], pp["bg"], pp["wb"], pp["bb"]]
    consts += [pp["w2"], pp["b2"], pp["w3"], pp["b3"]]
    in_specs += [const_spec(a) for a in consts]
    args += consts

    kernel = functools.partial(_fused_disc_kernel, cfg=cfg, use_sft=use_sft,
                               slope=_LRELU_SLOPE)

    out_full = pl.pallas_call(
        kernel,
        out_shape=jax.ShapeDtypeStruct((B, mp3, _HEAD_LANES), jnp.float32),
        grid=(B,),
        in_specs=in_specs,
        out_specs=pl.BlockSpec((1, mp3, _HEAD_LANES), lambda b: (b, 0, 0)),
        scratch_shapes=[
            pltpu.VMEM((rows1, 4 * ndf), jnp.float32),    # conv1 input slab (s2d)
            pltpu.VMEM((rows2, 8 * ndf), jnp.float32),    # conv2 input slab (s2d)
            pltpu.VMEM((rows3, 4 * ndf), jnp.float32),    # conv3 input slab (plain)
        ],
        compiler_params=pltpu.CompilerParams(
            dimension_semantics=("parallel",)),
    )(*args)

    head = out_full[:, :, 0].reshape(B, Ho3, Wp3)[:, :, :Wo3]        # drop padding
    return head[:, None, :, :]                                       # [B,1,H/8,W/8]


# ---------------------------------------------------------------------------
# Pure-JAX f32 reference (same math) for a tolerance check.
# ---------------------------------------------------------------------------
def _reference_forward(params, x_nchw, semantic_nchw=None, which_model_netD="sed_p"):
    x = jnp.transpose(x_nchw, (0, 2, 3, 1)).astype(jnp.float32)

    def conv(f, w_flat, b, k, stride):
        cin = f.shape[-1]
        w = w_flat.reshape(k, k, cin, -1).astype(jnp.float32)
        y = lax.conv_general_dilated(
            f, w, (stride, stride), ((1, 1), (1, 1)),
            dimension_numbers=("NHWC", "HWIO", "NHWC"))
        return y + b.reshape(1, 1, 1, -1)

    lrelu = lambda v: jnp.maximum(v, _LRELU_SLOPE * v)

    f = lrelu(conv(x, params["w0"], params["b0"], 4, 2))
    g = conv(f, params["w1"], params["b1"], 4, 2)
    if which_model_netD in {"sed_p", "sed_u"} and semantic_nchw is not None:
        sem = jnp.transpose(semantic_nchw, (0, 2, 3, 1)).astype(jnp.float32)
        sp = jnp.mean(sem, axis=(1, 2))
        gamma = sp @ params["wg"] + params["bg"]
        beta = sp @ params["wb"] + params["bb"]
        g = g * (1.0 + gamma[:, None, None, :]) + beta[:, None, None, :]
    g = lrelu(g)
    h = lrelu(conv(g, params["w2"], params["b2"], 4, 2))
    o = conv(h, params["w3"], params["b3"], 3, 1)
    return jnp.transpose(o, (0, 3, 1, 2))


# ---------------------------------------------------------------------------
if __name__ == "__main__":
    key = jax.random.PRNGKey(0)
    k_x, k_s, k_p = jax.random.split(key, 3)

    B, input_nc, H, W = 2, 3, 16, 16          # model_config['output_nc'/'output_size']
    ndf, sem_c, Hsem = 16, 32, 4              # G_config['input_layer_output'], semantic

    x = jax.random.normal(k_x, (B, input_nc, H, W), jnp.float32)
    semantic = jax.random.normal(k_s, (B, sem_c, Hsem, Hsem), jnp.float32)

    params = init_params(k_p, input_nc=input_nc, ndf=ndf, sem_c=sem_c)
    prepped = prepare_params(params)          # one-time weight repack (hoisted)

    fwd = jax.jit(functools.partial(discriminator_forward, which_model_netD="sed_p"))
    out = fwd(prepped, x, semantic)
    jax.block_until_ready(out)

    assert out.shape == (B, 1, H // 8, W // 8), out.shape
    assert out.dtype == jnp.float32
    assert bool(jnp.isfinite(out).all())

    # tolerance check: bf16 MXU inputs + f32 accumulation vs f32 XLA reference
    ref = _reference_forward(params, x, semantic, which_model_netD="sed_p")
    err = float(jnp.max(jnp.abs(out - ref)))
    assert err < 2e-3, f"kernel vs reference max abs err = {err}"

    print("KERNEL_OK")
</pallas_src>

<mosaic_0001>
module attributes {stable_mosaic.version = 11 : i64} {
  func.func @_fused_disc_kernel(%arg0: i32, %arg1: memref<1x88x12xbf16, #tpu.memory_space<vmem>>, %arg2: memref<1x1x32xf32, #tpu.memory_space<vmem>>, %arg3: memref<4x12x16xbf16, #tpu.memory_space<vmem>>, %arg4: memref<1x16xf32, #tpu.memory_space<vmem>>, %arg5: memref<4x64x32xbf16, #tpu.memory_space<vmem>>, %arg6: memref<1x32xf32, #tpu.memory_space<vmem>>, %arg7: memref<32x32xbf16, #tpu.memory_space<vmem>>, %arg8: memref<1x32xf32, #tpu.memory_space<vmem>>, %arg9: memref<32x32xbf16, #tpu.memory_space<vmem>>, %arg10: memref<1x32xf32, #tpu.memory_space<vmem>>, %arg11: memref<4x128x64xbf16, #tpu.memory_space<vmem>>, %arg12: memref<1x64xf32, #tpu.memory_space<vmem>>, %arg13: memref<9x64x128xbf16, #tpu.memory_space<vmem>>, %arg14: memref<1x128xf32, #tpu.memory_space<vmem>>, %arg15: memref<1x8x128xf32, #tpu.memory_space<vmem>>, %arg16: memref<32x64xf32, #tpu.memory_space<vmem>>, %arg17: memref<16x128xf32, #tpu.memory_space<vmem>>, %arg18: memref<24x64xf32, #tpu.memory_space<vmem>>) attributes {dimension_semantics = [#tpu.dimension_semantics<parallel>], iteration_bounds = array<i64: 2>, scalar_prefetch = 0 : i64, scratch_operands = 3 : i64, tpu.core_type = #tpu.core_type<tc>, window_params = [{transform_indices = @transform_0, window_bounds = array<i64: 1, 88, 12>}, {transform_indices = @transform_1, window_bounds = array<i64: 1, 1, 32>}, {pipeline_mode = #tpu.pipeline_mode<synchronous>, transform_indices = @transform_2, window_bounds = array<i64: 4, 12, 16>}, {pipeline_mode = #tpu.pipeline_mode<synchronous>, transform_indices = @transform_3, window_bounds = array<i64: 1, 16>}, {pipeline_mode = #tpu.pipeline_mode<synchronous>, transform_indices = @transform_4, window_bounds = array<i64: 4, 64, 32>}, {pipeline_mode = #tpu.pipeline_mode<synchronous>, transform_indices = @transform_5, window_bounds = array<i64: 1, 32>}, {pipeline_mode = #tpu.pipeline_mode<synchronous>, transform_indices = @transform_6, window_bounds = array<i64: 32, 32>}, {pipeline_mode = #tpu.pipeline_mode<synchronous>, transform_indices = @transform_7, window_bounds = array<i64: 1, 32>}, {pipeline_mode = #tpu.pipeline_mode<synchronous>, transform_indices = @transform_8, window_bounds = array<i64: 32, 32>}, {pipeline_mode = #tpu.pipeline_mode<synchronous>, transform_indices = @transform_9, window_bounds = array<i64: 1, 32>}, {pipeline_mode = #tpu.pipeline_mode<synchronous>, transform_indices = @transform_10, window_bounds = array<i64: 4, 128, 64>}, {pipeline_mode = #tpu.pipeline_mode<synchronous>, transform_indices = @transform_11, window_bounds = array<i64: 1, 64>}, {pipeline_mode = #tpu.pipeline_mode<synchronous>, transform_indices = @transform_12, window_bounds = array<i64: 9, 64, 128>}, {pipeline_mode = #tpu.pipeline_mode<synchronous>, transform_indices = @transform_13, window_bounds = array<i64: 1, 128>}, {transform_indices = @transform_14, window_bounds = array<i64: 1, 8, 128>}]} {
    %cst = arith.constant 0.000000e+00 : f32
    %0 = vector.broadcast %cst : f32 to vector<32x64xf32>
    %c0 = arith.constant 0 : index
    %c0_0 = arith.constant 0 : index
    %1 = vector.load %arg16[%c0, %c0_0] : memref<32x64xf32, #tpu.memory_space<vmem>>, vector<32x64xf32>
    tpu.vector_store %arg16[%c0, %c0_0], %0 {strides = array<i32>} : memref<32x64xf32, #tpu.memory_space<vmem>>, vector<32x64xf32>,
    %cst_1 = arith.constant 0.000000e+00 : f32
    %2 = vector.broadcast %cst_1 : f32 to vector<16x128xf32>
    %c0_2 = arith.constant 0 : index
    %c0_3 = arith.constant 0 : index
    %3 = vector.load %arg17[%c0_2, %c0_3] : memref<16x128xf32, #tpu.memory_space<vmem>>, vector<16x128xf32>
    tpu.vector_store %arg17[%c0_2, %c0_3], %2 {strides = array<i32>} : memref<16x128xf32, #tpu.memory_space<vmem>>, vector<16x128xf32>,
    %cst_4 = arith.constant 0.000000e+00 : f32
    %4 = vector.broadcast %cst_4 : f32 to vector<24x64xf32>
    %c0_5 = arith.constant 0 : index
    %c0_6 = arith.constant 0 : index
    %5 = vector.load %arg18[%c0_5, %c0_6] : memref<24x64xf32, #tpu.memory_space<vmem>>, vector<24x64xf32>
    tpu.vector_store %arg18[%c0_5, %c0_6], %4 {strides = array<i32>} : memref<24x64xf32, #tpu.memory_space<vmem>>, vector<24x64xf32>,
    %cst_7 = arith.constant 0.000000e+00 : f32
    %6 = vector.broadcast %cst_7 : f32 to vector<72x16xf32>
    %c0_8 = arith.constant 0 : index
    %c0_9 = arith.constant 0 : index
    %c0_10 = arith.constant 0 : index
    %7 = vector.load %arg1[%c0_8, %c0_9, %c0_10] : memref<1x88x12xbf16, #tpu.memory_space<vmem>>, vector<1x72x12xbf16>
    %8 = vector.shape_cast %7 : vector<1x72x12xbf16> to vector<72x12xbf16>
    %c0_11 = arith.constant 0 : index
    %c0_12 = arith.constant 0 : index
    %c0_13 = arith.constant 0 : index
    %9 = vector.load %arg3[%c0_11, %c0_12, %c0_13] : memref<4x12x16xbf16, #tpu.memory_space<vmem>>, vector<1x12x16xbf16>
    %10 = vector.shape_cast %9 : vector<1x12x16xbf16> to vector<12x16xbf16>
    %cst_14 = arith.constant dense<0.000000e+00> : vector<72x16xf32>
    %11 = tpu.matmul %8, %10, %cst_14 {dimension_numbers = #tpu.dot_dimension_numbers<[1], [0], [0], [1], [0, 0, 1, 1], [], []>} : vector<72x12xbf16>, vector<12x16xbf16>, vector<72x16xf32> -> vector<72x16xf32>
    %12 = arith.addf %6, %11 : vector<72x16xf32>
    %c0_15 = arith.constant 0 : index
    %c1 = arith.constant 1 : index
    %c0_16 = arith.constant 0 : index
    %13 = vector.load %arg1[%c0_15, %c1, %c0_16] : memref<1x88x12xbf16, #tpu.memory_space<vmem>>, vector<1x72x12xbf16>
    %14 = vector.shape_cast %13 : vector<1x72x12xbf16> to vector<72x12xbf16>
    %c1_17 = arith.constant 1 : index
    %c0_18 = arith.constant 0 : index
    %c0_19 = arith.constant 0 : index
    %15 = vector.load %arg3[%c1_17, %c0_18, %c0_19] : memref<4x12x16xbf16, #tpu.memory_space<vmem>>, vector<1x12x16xbf16>
    %16 = vector.shape_cast %15 : vector<1x12x16xbf16> to vector<12x16xbf16>
    %cst_20 = arith.constant dense<0.000000e+00> : vector<72x16xf32>
    %17 = tpu.matmul %14, %16, %cst_20 {dimension_numbers = #tpu.dot_dimension_numbers<[1], [0], [0], [1], [0, 0, 1, 1], [], []>} : vector<72x12xbf16>, vector<12x16xbf16>, vector<72x16xf32> -> vector<72x16xf32>
    %18 = arith.addf %12, %17 : vector<72x16xf32>
    %c0_21 = arith.constant 0 : index
    %c9 = arith.constant 9 : index
    %c0_22 = arith.constant 0 : index
    %19 = vector.load %arg1[%c0_21, %c9, %c0_22] : memref<1x88x12xbf16, #tpu.memory_space<vmem>>, vector<1x72x12xbf16>
    %20 = vector.shape_cast %19 : vector<1x72x12xbf16> to vector<72x12xbf16>
    %c2 = arith.constant 2 : index
    %c0_23 = arith.constant 0 : index
    %c0_24 = arith.constant 0 : index
    %21 = vector.load %arg3[%c2, %c0_23, %c0_24] : memref<4x12x16xbf16, #tpu.memory_space<vmem>>, vector<1x12x16xbf16>
    %22 = vector.shape_cast %21 : vector<1x12x16xbf16> to vector<12x16xbf16>
    %cst_25 = arith.constant dense<0.000000e+00> : vector<72x16xf32>
    %23 = tpu.matmul %20, %22, %cst_25 {dimension_numbers = #tpu.dot_dimension_numbers<[1], [0], [0], [1], [0, 0, 1, 1], [], []>} : vector<72x12xbf16>, vector<12x16xbf16>, vector<72x16xf32> -> vector<72x16xf32>
    %24 = arith.addf %18, %23 : vector<72x16xf32>
    %c0_26 = arith.constant 0 : index
    %c10 = arith.constant 10 : index
    %c0_27 = arith.constant 0 : index
    %25 = vector.load %arg1[%c0_26, %c10, %c0_27] : memref<1x88x12xbf16, #tpu.memory_space<vmem>>, vector<1x72x12xbf16>
    %26 = vector.shape_cast %25 : vector<1x72x12xbf16> to vector<72x12xbf16>
    %c3 = arith.constant 3 : index
    %c0_28 = arith.constant 0 : index
    %c0_29 = arith.constant 0 : index
    %27 = vector.load %arg3[%c3, %c0_28, %c0_29] : memref<4x12x16xbf16, #tpu.memory_space<vmem>>, vector<1x12x16xbf16>
    %28 = vector.shape_cast %27 : vector<1x12x16xbf16> to vector<12x16xbf16>
    %cst_30 = arith.constant dense<0.000000e+00> : vector<72x16xf32>
    %29 = tpu.matmul %26, %28, %cst_30 {dimension_numbers = #tpu.dot_dimension_numbers<[1], [0], [0], [1], [0, 0, 1, 1], [], []>} : vector<72x12xbf16>, vector<12x16xbf16>, vector<72x16xf32> -> vector<72x16xf32>
    %30 = arith.addf %24, %29 : vector<72x16xf32>
    %c0_31 = arith.constant 0 : index
    %c0_32 = arith.constant 0 : index
    %31 = vector.load %arg4[%c0_31, %c0_32] : memref<1x16xf32, #tpu.memory_space<vmem>>, vector<1x16xf32>
    %32 = vector.broadcast %31 : vector<1x16xf32> to vector<72x16xf32>
    %33 = arith.addf %30, %32 : vector<72x16xf32>
    %cst_33 = arith.constant 2.000000e-01 : f32
    %34 = vector.broadcast %cst_33 : f32 to vector<72x16xf32>
    %35 = arith.mulf %34, %33 : vector<72x16xf32>
    %36 = arith.maximumf %33, %35 : vector<72x16xf32>
    %37 = vector.extract_strided_slice %36 {offsets = [0, 0], sizes = [1, 16], strides = [1, 1]} : vector<72x16xf32> to vector<1x16xf32>
    %c0_34 = arith.constant 0 : index
    %c48 = arith.constant 48 : index
    %38 = vector.load %arg16[%c0_34, %c48] : memref<32x64xf32, #tpu.memory_space<vmem>>, vector<1x16xf32>
    tpu.vector_store %arg16[%c0_34, %c48], %37 {strides = array<i32>} : memref<32x64xf32, #tpu.memory_space<vmem>>, vector<1x16xf32>,
    %39 = vector.extract_strided_slice %36 {offsets = [1, 0], sizes = [1, 16], strides = [1, 1]} : vector<72x16xf32> to vector<1x16xf32>
    %c1_35 = arith.constant 1 : index
    %c32 = arith.constant 32 : index
    %40 = vector.load %arg16[%c1_35, %c32] : memref<32x64xf32, #tpu.memory_space<vmem>>, vector<1x16xf32>
    tpu.vector_store %arg16[%c1_35, %c32], %39 {strides = array<i32>} : memref<32x64xf32, #tpu.memory_space<vmem>>, vector<1x16xf32>,
    %41 = vector.extract_strided_slice %36 {offsets = [2, 0], sizes = [1, 16], strides = [1, 1]} : vector<72x16xf32> to vector<1x16xf32>
    %c1_36 = arith.constant 1 : index
    %c48_37 = arith.constant 48 : index
    %42 = vector.load %arg16[%c1_36, %c48_37] : memref<32x64xf32, #tpu.memory_space<vmem>>, vector<1x16xf32>
    tpu.vector_store %arg16[%c1_36, %c48_37], %41 {strides = array<i32>} : memref<32x64xf32, #tpu.memory_space<vmem>>, vector<1x16xf32>,
    %43 = vector.extract_strided_slice %36 {offsets = [3, 0], sizes = [1, 16], strides = [1, 1]} : vector<72x16xf32> to vector<1x16xf32>
    %c2_38 = arith.constant 2 : index
    %c32_39 = arith.constant 32 : index
    %44 = vector.load %arg16[%c2_38, %c32_39] : memref<32x64xf32, #tpu.memory_space<vmem>>, vector<1x16xf32>
    tpu.vector_store %arg16[%c2_38, %c32_39], %43 {strides = array<i32>} : memref<32x64xf32, #tpu.memory_space<vmem>>, vector<1x16xf32>,
    %45 = vector.extract_strided_slice %36 {offsets = [4, 0], sizes = [1, 16], strides = [1, 1]} : vector<72x16xf32> to vector<1x16xf32>
    %c2_40 = arith.constant 2 : index
    %c48_41 = arith.constant 48 : index
    %46 = vector.load %arg16[%c2_40, %c48_41] : memref<32x64xf32, #tpu.memory_space<vmem>>, vector<1x16xf32>
    tpu.vector_store %arg16[%c2_40, %c48_41], %45 {strides = array<i32>} : memref<32x64xf32, #tpu.memory_space<vmem>>, vector<1x16xf32>,
    %47 = vector.extract_strided_slice %36 {offsets = [5, 0], sizes = [1, 16], strides = [1, 1]} : vector<72x16xf32> to vector<1x16xf32>
    %c3_42 = arith.constant 3 : index
    %c32_43 = arith.constant 32 : index
    %48 = vector.load %arg16[%c3_42, %c32_43] : memref<32x64xf32, #tpu.memory_space<vmem>>, vector<1x16xf32>
    tpu.vector_store %arg16[%c3_42, %c32_43], %47 {strides = array<i32>} : memref<32x64xf32, #tpu.memory_space<vmem>>, vector<1x16xf32>,
    %49 = vector.extract_strided_slice %36 {offsets = [6, 0], sizes = [1, 16], strides = [1, 1]} : vector<72x16xf32> to vector<1x16xf32>
    %c3_44 = arith.constant 3 : index
    %c48_45 = arith.constant 48 : index
    %50 = vector.load %arg16[%c3_44, %c48_45] : memref<32x64xf32, #tpu.memory_space<vmem>>, vector<1x16xf32>
    tpu.vector_store %arg16[%c3_44, %c48_45], %49 {strides = array<i32>} : memref<32x64xf32, #tpu.memory_space<vmem>>, vector<1x16xf32>,
    %51 = vector.extract_strided_slice %36 {offsets = [7, 0], sizes = [1, 16], strides = [1, 1]} : vector<72x16xf32> to vector<1x16xf32>
    %c4 = arith.constant 4 : index
    %c32_46 = arith.constant 32 : index
    %52 = vector.load %arg16[%c4, %c32_46] : memref<32x64xf32, #tpu.memory_space<vmem>>, vector<1x16xf32>
    tpu.vector_store %arg16[%c4, %c32_46], %51 {strides = array<i32>} : memref<32x64xf32, #tpu.memory_space<vmem>>, vector<1x16xf32>,
    %53 = vector.extract_strided_slice %36 {offsets = [9, 0], sizes = [1, 16], strides = [1, 1]} : vector<72x16xf32> to vector<1x16xf32>
    %c5 = arith.constant 5 : index
    %c16 = arith.constant 16 : index
    %54 = vector.load %arg16[%c5, %c16] : memref<32x64xf32, #tpu.memory_space<vmem>>, vector<1x16xf32>
    tpu.vector_store %arg16[%c5, %c16], %53 {strides = array<i32>} : memref<32x64xf32, #tpu.memory_space<vmem>>, vector<1x16xf32>,
    %55 = vector.extract_strided_slice %36 {offsets = [10, 0], sizes = [1, 16], strides = [1, 1]} : vector<72x16xf32> to vector<1x16xf32>
    %c6 = arith.constant 6 : index
    %c0_47 = arith.constant 0 : index
    %56 = vector.load %arg16[%c6, %c0_47] : memref<32x64xf32, #tpu.memory_space<vmem>>, vector<1x16xf32>
    tpu.vector_store %arg16[%c6, %c0_47], %55 {strides = array<i32>} : memref<32x64xf32, #tpu.memory_space<vmem>>, vector<1x16xf32>,
    %57 = vector.extract_strided_slice %36 {offsets = [11, 0], sizes = [1, 16], strides = [1, 1]} : vector<72x16xf32> to vector<1x16xf32>
    %c6_48 = arith.constant 6 : index
    %c16_49 = arith.constant 16 : index
    %58 = vector.load %arg16[%c6_48, %c16_49] : memref<32x64xf32, #tpu.memory_space<vmem>>, vector<1x16xf32>
    tpu.vector_store %arg16[%c6_48, %c16_49], %57 {strides = array<i32>} : memref<32x64xf32, #tpu.memory_space<vmem>>, vector<1x16xf32>,
    %59 = vector.extract_strided_slice %36 {offsets = [12, 0], sizes = [1, 16], strides = [1, 1]} : vector<72x16xf32> to vector<1x16xf32>
    %c7 = arith.constant 7 : index
    %c0_50 = arith.constant 0 : index
    %60 = vector.load %arg16[%c7, %c0_50] : memref<32x64xf32, #tpu.memory_space<vmem>>, vector<1x16xf32>
    tpu.vector_store %arg16[%c7, %c0_50], %59 {strides = array<i32>} : memref<32x64xf32, #tpu.memory_space<vmem>>, vector<1x16xf32>,
    %61 = vector.extract_strided_slice %36 {offsets = [13, 0], sizes = [1, 16], strides = [1, 1]} : vector<72x16xf32> to vector<1x16xf32>
    %c7_51 = arith.constant 7 : index
    %c16_52 = arith.constant 16 : index
    %62 = vector.load %arg16[%c7_51, %c16_52] : memref<32x64xf32, #tpu.memory_space<vmem>>, vector<1x16xf32>
    tpu.vector_store %arg16[%c7_51, %c16_52], %61 {strides = array<i32>} : memref<32x64xf32, #tpu.memory_space<vmem>>, vector<1x16xf32>,
    %63 = vector.extract_strided_slice %36 {offsets = [14, 0], sizes = [1, 16], strides = [1, 1]} : vector<72x16xf32> to vector<1x16xf32>
    %c8 = arith.constant 8 : index
    %c0_53 = arith.constant 0 : index
    %64 = vector.load %arg16[%c8, %c0_53] : memref<32x64xf32, #tpu.memory_space<vmem>>, vector<1x16xf32>
    tpu.vector_store %arg16[%c8, %c0_53], %63 {strides = array<i32>} : memref<32x64xf32, #tpu.memory_space<vmem>>, vector<1x16xf32>,
    %65 = vector.extract_strided_slice %36 {offsets = [15, 0], sizes = [1, 16], strides = [1, 1]} : vector<72x16xf32> to vector<1x16xf32>
    %c8_54 = arith.constant 8 : index
    %c16_55 = arith.constant 16 : index
    %66 = vector.load %arg16[%c8_54, %c16_55] : memref<32x64xf32, #tpu.memory_space<vmem>>, vector<1x16xf32>
    tpu.vector_store %arg16[%c8_54, %c16_55], %65 {strides = array<i32>} : memref<32x64xf32, #tpu.memory_space<vmem>>, vector<1x16xf32>,
    %67 = vector.extract_strided_slice %36 {offsets = [16, 0], sizes = [1, 16], strides = [1, 1]} : vector<72x16xf32> to vector<1x16xf32>
    %c9_56 = arith.constant 9 : index
    %c0_57 = arith.constant 0 : index
    %68 = vector.load %arg16[%c9_56, %c0_57] : memref<32x64xf32, #tpu.memory_space<vmem>>, vector<1x16xf32>
    tpu.vector_store %arg16[%c9_56, %c0_57], %67 {strides = array<i32>} : memref<32x64xf32, #tpu.memory_space<vmem>>, vector<1x16xf32>,
    %69 = vector.extract_strided_slice %36 {offsets = [18, 0], sizes = [1, 16], strides = [1, 1]} : vector<72x16xf32> to vector<1x16xf32>
    %c5_58 = arith.constant 5 : index
    %c48_59 = arith.constant 48 : index
    %70 = vector.load %arg16[%c5_58, %c48_59] : memref<32x64xf32, #tpu.memory_space<vmem>>, vector<1x16xf32>
    tpu.vector_store %arg16[%c5_58, %c48_59], %69 {strides = array<i32>} : memref<32x64xf32, #tpu.memory_space<vmem>>, vector<1x16xf32>,
    %71 = vector.extract_strided_slice %36 {offsets = [19, 0], sizes = [1, 16], strides = [1, 1]} : vector<72x16xf32> to vector<1x16xf32>
    %c6_60 = arith.constant 6 : index
    %c32_61 = arith.constant 32 : index
    %72 = vector.load %arg16[%c6_60, %c32_61] : memref<32x64xf32, #tpu.memory_space<vmem>>, vector<1x16xf32>
    tpu.vector_store %arg16[%c6_60, %c32_61], %71 {strides = array<i32>} : memref<32x64xf32, #tpu.memory_space<vmem>>, vector<1x16xf32>,
    %73 = vector.extract_strided_slice %36 {offsets = [20, 0], sizes = [1, 16], strides = [1, 1]} : vector<72x16xf32> to vector<1x16xf32>
    %c6_62 = arith.constant 6 : index
    %c48_63 = arith.constant 48 : index
    %74 = vector.load %arg16[%c6_62, %c48_63] : memref<32x64xf32, #tpu.memory_space<vmem>>, vector<1x16xf32>
    tpu.vector_store %arg16[%c6_62, %c48_63], %73 {strides = array<i32>} : memref<32x64xf32, #tpu.memory_space<vmem>>, vector<1x16xf32>,
    %75 = vector.extract_strided_slice %36 {offsets = [21, 0], sizes = [1, 16], strides = [1, 1]} : vector<72x16xf32> to vector<1x16xf32>
    %c7_64 = arith.constant 7 : index
    %c32_65 = arith.constant 32 : index
    %76 = vector.load %arg16[%c7_64, %c32_65] : memref<32x64xf32, #tpu.memory_space<vmem>>, vector<1x16xf32>
    tpu.vector_store %arg16[%c7_64, %c32_65], %75 {strides = array<i32>} : memref<32x64xf32, #tpu.memory_space<vmem>>, vector<1x16xf32>,
    %77 = vector.extract_strided_slice %36 {offsets = [22, 0], sizes = [1, 16], strides = [1, 1]} : vector<72x16xf32> to vector<1x16xf32>
    %c7_66 = arith.constant 7 : index
    %c48_67 = arith.constant 48 : index
    %78 = vector.load %arg16[%c7_66, %c48_67] : memref<32x64xf32, #tpu.memory_space<vmem>>, vector<1x16xf32>
    tpu.vector_store %arg16[%c7_66, %c48_67], %77 {strides = array<i32>} : memref<32x64xf32, #tpu.memory_space<vmem>>, vector<1x16xf32>,
    %79 = vector.extract_strided_slice %36 {offsets = [23, 0], sizes = [1, 16], strides = [1, 1]} : vector<72x16xf32> to vector<1x16xf32>
    %c8_68 = arith.constant 8 : index
    %c32_69 = arith.constant 32 : index
    %80 = vector.load %arg16[%c8_68, %c32_69] : memref<32x64xf32, #tpu.memory_space<vmem>>, vector<1x16xf32>
    tpu.vector_store %arg16[%c8_68, %c32_69], %79 {strides = array<i32>} : memref<32x64xf32, #tpu.memory_space<vmem>>, vector<1x16xf32>,
    %81 = vector.extract_strided_slice %36 {offsets = [24, 0], sizes = [1, 16], strides = [1, 1]} : vector<72x16xf32> to vector<1x16xf32>
    %c8_70 = arith.constant 8 : index
    %c48_71 = arith.constant 48 : index
    %82 = vector.load %arg16[%c8_70, %c48_71] : memref<32x64xf32, #tpu.memory_space<vmem>>, vector<1x16xf32>
    tpu.vector_store %arg16[%c8_70, %c48_71], %81 {strides = array<i32>} : memref<32x64xf32, #tpu.memory_space<vmem>>, vector<1x16xf32>,
    %83 = vector.extract_strided_slice %36 {offsets = [25, 0], sizes = [1, 16], strides = [1, 1]} : vector<72x16xf32> to vector<1x16xf32>
    %c9_72 = arith.constant 9 : index
    %c32_73 = arith.constant 32 : index
    %84 = vector.load %arg16[%c9_72, %c32_73] : memref<32x64xf32, #tpu.memory_space<vmem>>, vector<1x16xf32>
    tpu.vector_store %arg16[%c9_72, %c32_73], %83 {strides = array<i32>} : memref<32x64xf32, #tpu.memory_space<vmem>>, vector<1x16xf32>,
    %85 = vector.extract_strided_slice %36 {offsets = [27, 0], sizes = [1, 16], strides = [1, 1]} : vector<72x16xf32> to vector<1x16xf32>
    %c10_74 = arith.constant 10 : index
    %c16_75 = arith.constant 16 : index
    %86 = vector.load %arg16[%c10_74, %c16_75] : memref<32x64xf32, #tpu.memory_space<vmem>>, vector<1x16xf32>
    tpu.vector_store %arg16[%c10_74, %c16_75], %85 {strides = array<i32>} : memref<32x64xf32, #tpu.memory_space<vmem>>, vector<1x16xf32>,
    %87 = vector.extract_strided_slice %36 {offsets = [28, 0], sizes = [1, 16], strides = [1, 1]} : vector<72x16xf32> to vector<1x16xf32>
    %c11 = arith.constant 11 : index
    %c0_76 = arith.constant 0 : index
    %88 = vector.load %arg16[%c11, %c0_76] : memref<32x64xf32, #tpu.memory_space<vmem>>, vector<1x16xf32>
    tpu.vector_store %arg16[%c11, %c0_76], %87 {strides = array<i32>} : memref<32x64xf32, #tpu.memory_space<vmem>>, vector<1x16xf32>,
    %89 = vector.extract_strided_slice %36 {offsets = [29, 0], sizes = [1, 16], strides = [1, 1]} : vector<72x16xf32> to vector<1x16xf32>
    %c11_77 = arith.constant 11 : index
    %c16_78 = arith.constant 16 : index
    %90 = vector.load %arg16[%c11_77, %c16_78] : memref<32x64xf32, #tpu.memory_space<vmem>>, vector<1x16xf32>
    tpu.vector_store %arg16[%c11_77, %c16_78], %89 {strides = array<i32>} : memref<32x64xf32, #tpu.memory_space<vmem>>, vector<1x16xf32>,
    %91 = vector.extract_strided_slice %36 {offsets = [30, 0], sizes = [1, 16], strides = [1, 1]} : vector<72x16xf32> to vector<1x16xf32>
    %c12 = arith.constant 12 : index
    %c0_79 = arith.constant 0 : index
    %92 = vector.load %arg16[%c12, %c0_79] : memref<32x64xf32, #tpu.memory_space<vmem>>, vector<1x16xf32>
    tpu.vector_store %arg16[%c12, %c0_79], %91 {strides = array<i32>} : memref<32x64xf32, #tpu.memory_space<vmem>>, vector<1x16xf32>,
    %93 = vector.extract_strided_slice %36 {offsets = [31, 0], sizes = [1, 16], strides = [1, 1]} : vector<72x16xf32> to vector<1x16xf32>
    %c12_80 = arith.constant 12 : index
    %c16_81 = arith.constant 16 : index
    %94 = vector.load %arg16[%c12_80, %c16_81] : memref<32x64xf32, #tpu.memory_space<vmem>>, vector<1x16xf32>
    tpu.vector_store %arg16[%c12_80, %c16_81], %93 {strides = array<i32>} : memref<32x64xf32, #tpu.memory_space<vmem>>, vector<1x16xf32>,
    %95 = vector.extract_strided_slice %36 {offsets = [32, 0], sizes = [1, 16], strides = [1, 1]} : vector<72x16xf32> to vector<1x16xf32>
    %c13 = arith.constant 13 : index
    %c0_82 = arith.constant 0 : index
    %96 = vector.load %arg16[%c13, %c0_82] : memref<32x64xf32, #tpu.memory_space<vmem>>, vector<1x16xf32>
    tpu.vector_store %arg16[%c13, %c0_82], %95 {strides = array<i32>} : memref<32x64xf32, #tpu.memory_space<vmem>>, vector<1x16xf32>,
    %97 = vector.extract_strided_slice %36 {offsets = [33, 0], sizes = [1, 16], strides = [1, 1]} : vector<72x16xf32> to vector<1x16xf32>
    %c13_83 = arith.constant 13 : index
    %c16_84 = arith.constant 16 : index
    %98 = vector.load %arg16[%c13_83, %c16_84] : memref<32x64xf32, #tpu.memory_space<vmem>>, vector<1x16xf32>
    tpu.vector_store %arg16[%c13_83, %c16_84], %97 {strides = array<i32>} : memref<32x64xf32, #tpu.memory_space<vmem>>, vector<1x16xf32>,
    %99 = vector.extract_strided_slice %36 {offsets = [34, 0], sizes = [1, 16], strides = [1, 1]} : vector<72x16xf32> to vector<1x16xf32>
    %c14 = arith.constant 14 : index
    %c0_85 = arith.constant 0 : index
    %100 = vector.load %arg16[%c14, %c0_85] : memref<32x64xf32, #tpu.memory_space<vmem>>, vector<1x16xf32>
    tpu.vector_store %arg16[%c14, %c0_85], %99 {strides = array<i32>} : memref<32x64xf32, #tpu.memory_space<vmem>>, vector<1x16xf32>,
    %101 = vector.extract_strided_slice %36 {offsets = [36, 0], sizes = [1, 16], strides = [1, 1]} : vector<72x16xf32> to vector<1x16xf32>
    %c10_86 = arith.constant 10 : index
    %c48_87 = arith.constant 48 : index
    %102 = vector.load %arg16[%c10_86, %c48_87] : memref<32x64xf32, #tpu.memory_space<vmem>>, vector<1x16xf32>
    tpu.vector_store %arg16[%c10_86, %c48_87], %101 {strides = array<i32>} : memref<32x64xf32, #tpu.memory_space<vmem>>, vector<1x16xf32>,
    %103 = vector.extract_strided_slice %36 {offsets = [37, 0], sizes = [1, 16], strides = [1, 1]} : vector<72x16xf32> to vector<1x16xf32>
    %c11_88 = arith.constant 11 : index
    %c32_89 = arith.constant 32 : index
    %104 = vector.load %arg16[%c11_88, %c32_89] : memref<32x64xf32, #tpu.memory_space<vmem>>, vector<1x16xf32>
    tpu.vector_store %arg16[%c11_88, %c32_89], %103 {strides = array<i32>} : memref<32x64xf32, #tpu.memory_space<vmem>>, vector<1x16xf32>,
    %105 = vector.extract_strided_slice %36 {offsets = [38, 0], sizes = [1, 16], strides = [1, 1]} : vector<72x16xf32> to vector<1x16xf32>
    %c11_90 = arith.constant 11 : index
    %c48_91 = arith.constant 48 : index
    %106 = vector.load %arg16[%c11_90, %c48_91] : memref<32x64xf32, #tpu.memory_space<vmem>>, vector<1x16xf32>
    tpu.vector_store %arg16[%c11_90, %c48_91], %105 {strides = array<i32>} : memref<32x64xf32, #tpu.memory_space<vmem>>, vector<1x16xf32>,
    %107 = vector.extract_strided_slice %36 {offsets = [39, 0], sizes = [1, 16], strides = [1, 1]} : vector<72x16xf32> to vector<1x16xf32>
    %c12_92 = arith.constant 12 : index
    %c32_93 = arith.constant 32 : index
    %108 = vector.load %arg16[%c12_92, %c32_93] : memref<32x64xf32, #tpu.memory_space<vmem>>, vector<1x16xf32>
    tpu.vector_store %arg16[%c12_92, %c32_93], %107 {strides = array<i32>} : memref<32x64xf32, #tpu.memory_space<vmem>>, vector<1x16xf32>,
    %109 = vector.extract_strided_slice %36 {offsets = [40, 0], sizes = [1, 16], strides = [1, 1]} : vector<72x16xf32> to vector<1x16xf32>
    %c12_94 = arith.constant 12 : index
    %c48_95 = arith.constant 48 : index
    %110 = vector.load %arg16[%c12_94, %c48_95] : memref<32x64xf32, #tpu.memory_space<vmem>>, vector<1x16xf32>
    tpu.vector_store %arg16[%c12_94, %c48_95], %109 {strides = array<i32>} : memref<32x64xf32, #tpu.memory_space<vmem>>, vector<1x16xf32>,
    %111 = vector.extract_strided_slice %36 {offsets = [41, 0], sizes = [1, 16], strides = [1, 1]} : vector<72x16xf32> to vector<1x16xf32>
    %c13_96 = arith.constant 13 : index
    %c32_97 = arith.constant 32 : index
    %112 = vector.load %arg16[%c13_96, %c32_97] : memref<32x64xf32, #tpu.memory_space<vmem>>, vector<1x16xf32>
    tpu.vector_store %arg16[%c13_96, %c32_97], %111 {strides = array<i32>} : memref<32x64xf32, #tpu.memory_space<vmem>>, vector<1x16xf32>,
    %113 = vector.extract_strided_slice %36 {offsets = [42, 0], sizes = [1, 16], strides = [1, 1]} : vector<72x16xf32> to vector<1x16xf32>
    %c13_98 = arith.constant 13 : index
    %c48_99 = arith.constant 48 : index
    %114 = vector.load %arg16[%c13_98, %c48_99] : memref<32x64xf32, #tpu.memory_space<vmem>>, vector<1x16xf32>
    tpu.vector_store %arg16[%c13_98, %c48_99], %113 {strides = array<i32>} : memref<32x64xf32, #tpu.memory_space<vmem>>, vector<1x16xf32>,
    %115 = vector.extract_strided_slice %36 {offsets = [43, 0], sizes = [1, 16], strides = [1, 1]} : vector<72x16xf32> to vector<1x16xf32>
    %c14_100 = arith.constant 14 : index
    %c32_101 = arith.constant 32 : index
    %116 = vector.load %arg16[%c14_100, %c32_101] : memref<32x64xf32, #tpu.memory_space<vmem>>, vector<1x16xf32>
    tpu.vector_store %arg16[%c14_100, %c32_101], %115 {strides = array<i32>} : memref<32x64xf32, #tpu.memory_space<vmem>>, vector<1x16xf32>,
    %117 = vector.extract_strided_slice %36 {offsets = [45, 0], sizes = [1, 16], strides = [1, 1]} : vector<72x16xf32> to vector<1x16xf32>
    %c15 = arith.constant 15 : index
    %c16_102 = arith.constant 16 : index
    %118 = vector.load %arg16[%c15, %c16_102] : memref<32x64xf32, #tpu.memory_space<vmem>>, vector<1x16xf32>
    tpu.vector_store %arg16[%c15, %c16_102], %117 {strides = array<i32>} : memref<32x64xf32, #tpu.memory_space<vmem>>, vector<1x16xf32>,
    %119 = vector.extract_strided_slice %36 {offsets = [46, 0], sizes = [1, 16], strides = [1, 1]} : vector<72x16xf32> to vector<1x16xf32>
    %c16_103 = arith.constant 16 : index
    %c0_104 = arith.constant 0 : index
    %120 = vector.load %arg16[%c16_103, %c0_104] : memref<32x64xf32, #tpu.memory_space<vmem>>, vector<1x16xf32>
    tpu.vector_store %arg16[%c16_103, %c0_104], %119 {strides = array<i32>} : memref<32x64xf32, #tpu.memory_space<vmem>>, vector<1x16xf32>,
    %121 = vector.extract_strided_slice %36 {offsets = [47, 0], sizes = [1, 16], strides = [1, 1]} : vector<72x16xf32> to vector<1x16xf32>
    %c16_105 = arith.constant 16 : index
    %c16_106 = arith.constant 16 : index
    %122 = vector.load %arg16[%c16_105, %c16_106] : memref<32x64xf32, #tpu.memory_space<vmem>>, vector<1x16xf32>
    tpu.vector_store %arg16[%c16_105, %c16_106], %121 {strides = array<i32>} : memref<32x64xf32, #tpu.memory_space<vmem>>, vector<1x16xf32>,
    %123 = vector.extract_strided_slice %36 {offsets = [48, 0], sizes = [1, 16], strides = [1, 1]} : vector<72x16xf32> to vector<1x16xf32>
    %c17 = arith.constant 17 : index
    %c0_107 = arith.constant 0 : index
    %124 = vector.load %arg16[%c17, %c0_107] : memref<32x64xf32, #tpu.memory_space<vmem>>, vector<1x16xf32>
    tpu.vector_store %arg16[%c17, %c0_107], %123 {strides = array<i32>} : memref<32x64xf32, #tpu.memory_space<vmem>>, vector<1x16xf32>,
    %125 = vector.extract_strided_slice %36 {offsets = [49, 0], sizes = [1, 16], strides = [1, 1]} : vector<72x16xf32> to vector<1x16xf32>
    %c17_108 = arith.constant 17 : index
    %c16_109 = arith.constant 16 : index
    %126 = vector.load %arg16[%c17_108, %c16_109] : memref<32x64xf32, #tpu.memory_space<vmem>>, vector<1x16xf32>
    tpu.vector_store %arg16[%c17_108, %c16_109], %125 {strides = array<i32>} : memref<32x64xf32, #tpu.memory_space<vmem>>, vector<1x16xf32>,
    %127 = vector.extract_strided_slice %36 {offsets = [50, 0], sizes = [1, 16], strides = [1, 1]} : vector<72x16xf32> to vector<1x16xf32>
    %c18 = arith.constant 18 : index
    %c0_110 = arith.constant 0 : index
    %128 = vector.load %arg16[%c18, %c0_110] : memref<32x64xf32, #tpu.memory_space<vmem>>, vector<1x16xf32>
    tpu.vector_store %arg16[%c18, %c0_110], %127 {strides = array<i32>} : memref<32x64xf32, #tpu.memory_space<vmem>>, vector<1x16xf32>,
    %129 = vector.extract_strided_slice %36 {offsets = [51, 0], sizes = [1, 16], strides = [1, 1]} : vector<72x16xf32> to vector<1x16xf32>
    %c18_111 = arith.constant 18 : index
    %c16_112 = arith.constant 16 : index
    %130 = vector.load %arg16[%c18_111, %c16_112] : memref<32x64xf32, #tpu.memory_space<vmem>>, vector<1x16xf32>
    tpu.vector_store %arg16[%c18_111, %c16_112], %129 {strides = array<i32>} : memref<32x64xf32, #tpu.memory_space<vmem>>, vector<1x16xf32>,
    %131 = vector.extract_strided_slice %36 {offsets = [52, 0], sizes = [1, 16], strides = [1, 1]} : vector<72x16xf32> to vector<1x16xf32>
    %c19 = arith.constant 19 : index
    %c0_113 = arith.constant 0 : index
    %132 = vector.load %arg16[%c19, %c0_113] : memref<32x64xf32, #tpu.memory_space<vmem>>, vector<1x16xf32>
    tpu.vector_store %arg16[%c19, %c0_113], %131 {strides = array<i32>} : memref<32x64xf32, #tpu.memory_space<vmem>>, vector<1x16xf32>,
    %133 = vector.extract_strided_slice %36 {offsets = [54, 0], sizes = [1, 16], strides = [1, 1]} : vector<72x16xf32> to vector<1x16xf32>
    %c15_114 = arith.constant 15 : index
    %c48_115 = arith.constant 48 : index
    %134 = vector.load %arg16[%c15_114, %c48_115] : memref<32x64xf32, #tpu.memory_space<vmem>>, vector<1x16xf32>
    tpu.vector_store %arg16[%c15_114, %c48_115], %133 {strides = array<i32>} : memref<32x64xf32, #tpu.memory_space<vmem>>, vector<1x16xf32>,
    %135 = vector.extract_strided_slice %36 {offsets = [55, 0], sizes = [1, 16], strides = [1, 1]} : vector<72x16xf32> to vector<1x16xf32>
    %c16_116 = arith.constant 16 : index
    %c32_117 = arith.constant 32 : index
    %136 = vector.load %arg16[%c16_116, %c32_117] : memref<32x64xf32, #tpu.memory_space<vmem>>, vector<1x16xf32>
    tpu.vector_store %arg16[%c16_116, %c32_117], %135 {strides = array<i32>} : memref<32x64xf32, #tpu.memory_space<vmem>>, vector<1x16xf32>,
    %137 = vector.extract_strided_slice %36 {offsets = [56, 0], sizes = [1, 16], strides = [1, 1]} : vector<72x16xf32> to vector<1x16xf32>
    %c16_118 = arith.constant 16 : index
    %c48_119 = arith.constant 48 : index
    %138 = vector.load %arg16[%c16_118, %c48_119] : memref<32x64xf32, #tpu.memory_space<vmem>>, vector<1x16xf32>
    tpu.vector_store %arg16[%c16_118, %c48_119], %137 {strides = array<i32>} : memref<32x64xf32, #tpu.memory_space<vmem>>, vector<1x16xf32>,
    %139 = vector.extract_strided_slice %36 {offsets = [57, 0], sizes = [1, 16], strides = [1, 1]} : vector<72x16xf32> to vector<1x16xf32>
    %c17_120 = arith.constant 17 : index
    %c32_121 = arith.constant 32 : index
    %140 = vector.load %arg16[%c17_120, %c32_121] : memref<32x64xf32, #tpu.memory_space<vmem>>, vector<1x16xf32>
    tpu.vector_store %arg16[%c17_120, %c32_121], %139 {strides = array<i32>} : memref<32x64xf32, #tpu.memory_space<vmem>>, vector<1x16xf32>,
    %141 = vector.extract_strided_slice %36 {offsets = [58, 0], sizes = [1, 16], strides = [1, 1]} : vector<72x16xf32> to vector<1x16xf32>
    %c17_122 = arith.constant 17 : index
    %c48_123 = arith.constant 48 : index
    %142 = vector.load %arg16[%c17_122, %c48_123] : memref<32x64xf32, #tpu.memory_space<vmem>>, vector<1x16xf32>
    tpu.vector_store %arg16[%c17_122, %c48_123], %141 {strides = array<i32>} : memref<32x64xf32, #tpu.memory_space<vmem>>, vector<1x16xf32>,
    %143 = vector.extract_strided_slice %36 {offsets = [59, 0], sizes = [1, 16], strides = [1, 1]} : vector<72x16xf32> to vector<1x16xf32>
    %c18_124 = arith.constant 18 : index
    %c32_125 = arith.constant 32 : index
    %144 = vector.load %arg16[%c18_124, %c32_125] : memref<32x64xf32, #tpu.memory_space<vmem>>, vector<1x16xf32>
    tpu.vector_store %arg16[%c18_124, %c32_125], %143 {strides = array<i32>} : memref<32x64xf32, #tpu.memory_space<vmem>>, vector<1x16xf32>,
    %145 = vector.extract_strided_slice %36 {offsets = [60, 0], sizes = [1, 16], strides = [1, 1]} : vector<72x16xf32> to vector<1x16xf32>
    %c18_126 = arith.constant 18 : index
    %c48_127 = arith.constant 48 : index
    %146 = vector.load %arg16[%c18_126, %c48_127] : memref<32x64xf32, #tpu.memory_space<vmem>>, vector<1x16xf32>
    tpu.vector_store %arg16[%c18_126, %c48_127], %145 {strides = array<i32>} : memref<32x64xf32, #tpu.memory_space<vmem>>, vector<1x16xf32>,
    %147 = vector.extract_strided_slice %36 {offsets = [61, 0], sizes = [1, 16], strides = [1, 1]} : vector<72x16xf32> to vector<1x16xf32>
    %c19_128 = arith.constant 19 : index
    %c32_129 = arith.constant 32 : index
    %148 = vector.load %arg16[%c19_128, %c32_129] : memref<32x64xf32, #tpu.memory_space<vmem>>, vector<1x16xf32>
    tpu.vector_store %arg16[%c19_128, %c32_129], %147 {strides = array<i32>} : memref<32x64xf32, #tpu.memory_space<vmem>>, vector<1x16xf32>,
    %149 = vector.extract_strided_slice %36 {offsets = [63, 0], sizes = [1, 16], strides = [1, 1]} : vector<72x16xf32> to vector<1x16xf32>
    %c20 = arith.constant 20 : index
    %c16_130 = arith.constant 16 : index
    %150 = vector.load %arg16[%c20, %c16_130] : memref<32x64xf32, #tpu.memory_space<vmem>>, vector<1x16xf32>
    tpu.vector_store %arg16[%c20, %c16_130], %149 {strides = array<i32>} : memref<32x64xf32, #tpu.memory_space<vmem>>, vector<1x16xf32>,
    %151 = vector.extract_strided_slice %36 {offsets = [64, 0], sizes = [1, 16], strides = [1, 1]} : vector<72x16xf32> to vector<1x16xf32>
    %c21 = arith.constant 21 : index
    %c0_131 = arith.constant 0 : index
    %152 = vector.load %arg16[%c21, %c0_131] : memref<32x64xf32, #tpu.memory_space<vmem>>, vector<1x16xf32>
    tpu.vector_store %arg16[%c21, %c0_131], %151 {strides = array<i32>} : memref<32x64xf32, #tpu.memory_space<vmem>>, vector<1x16xf32>,
    %153 = vector.extract_strided_slice %36 {offsets = [65, 0], sizes = [1, 16], strides = [1, 1]} : vector<72x16xf32> to vector<1x16xf32>
    %c21_132 = arith.constant 21 : index
    %c16_133 = arith.constant 16 : index
    %154 = vector.load %arg16[%c21_132, %c16_133] : memref<32x64xf32, #tpu.memory_space<vmem>>, vector<1x16xf32>
    tpu.vector_store %arg16[%c21_132, %c16_133], %153 {strides = array<i32>} : memref<32x64xf32, #tpu.memory_space<vmem>>, vector<1x16xf32>,
    %155 = vector.extract_strided_slice %36 {offsets = [66, 0], sizes = [1, 16], strides = [1, 1]} : vector<72x16xf32> to vector<1x16xf32>
    %c22 = arith.constant 22 : index
    %c0_134 = arith.constant 0 : index
    %156 = vector.load %arg16[%c22, %c0_134] : memref<32x64xf32, #tpu.memory_space<vmem>>, vector<1x16xf32>
    tpu.vector_store %arg16[%c22, %c0_134], %155 {strides = array<i32>} : memref<32x64xf32, #tpu.memory_space<vmem>>, vector<1x16xf32>,
    %157 = vector.extract_strided_slice %36 {offsets = [67, 0], sizes = [1, 16], strides = [1, 1]} : vector<72x16xf32> to vector<1x16xf32>
    %c22_135 = arith.constant 22 : index
    %c16_136 = arith.constant 16 : index
    %158 = vector.load %arg16[%c22_135, %c16_136] : memref<32x64xf32, #tpu.memory_space<vmem>>, vector<1x16xf32>
    tpu.vector_store %arg16[%c22_135, %c16_136], %157 {strides = array<i32>} : memref<32x64xf32, #tpu.memory_space<vmem>>, vector<1x16xf32>,
    %159 = vector.extract_strided_slice %36 {offsets = [68, 0], sizes = [1, 16], strides = [1, 1]} : vector<72x16xf32> to vector<1x16xf32>
    %c23 = arith.constant 23 : index
    %c0_137 = arith.constant 0 : index
    %160 = vector.load %arg16[%c23, %c0_137] : memref<32x64xf32, #tpu.memory_space<vmem>>, vector<1x16xf32>
    tpu.vector_store %arg16[%c23, %c0_137], %159 {strides = array<i32>} : memref<32x64xf32, #tpu.memory_space<vmem>>, vector<1x16xf32>,
    %161 = vector.extract_strided_slice %36 {offsets = [69, 0], sizes = [1, 16], strides = [1, 1]} : vector<72x16xf32> to vector<1x16xf32>
    %c23_138 = arith.constant 23 : index
    %c16_139 = arith.constant 16 : index
    %162 = vector.load %arg16[%c23_138, %c16_139] : memref<32x64xf32, #tpu.memory_space<vmem>>, vector<1x16xf32>
    tpu.vector_store %arg16[%c23_138, %c16_139], %161 {strides = array<i32>} : memref<32x64xf32, #tpu.memory_space<vmem>>, vector<1x16xf32>,
    %163 = vector.extract_strided_slice %36 {offsets = [70, 0], sizes = [1, 16], strides = [1, 1]} : vector<72x16xf32> to vector<1x16xf32>
    %c24 = arith.constant 24 : index
    %c0_140 = arith.constant 0 : index
    %164 = vector.load %arg16[%c24, %c0_140] : memref<32x64xf32, #tpu.memory_space<vmem>>, vector<1x16xf32>
    tpu.vector_store %arg16[%c24, %c0_140], %163 {strides = array<i32>} : memref<32x64xf32, #tpu.memory_space<vmem>>, vector<1x16xf32>,
    %cst_141 = arith.constant 0.000000e+00 : f32
    %165 = vector.broadcast %cst_141 : f32 to vector<20x32xf32>
    %c0_142 = arith.constant 0 : index
    %c0_143 = arith.constant 0 : index
    %166 = vector.load %arg16[%c0_142, %c0_143] : memref<32x64xf32, #tpu.memory_space<vmem>>, vector<20x64xf32>
    %167 = arith.truncf %166 : vector<20x64xf32> to vector<20x64xbf16>
    %c0_144 = arith.constant 0 : index
    %c0_145 = arith.constant 0 : index
    %c0_146 = arith.constant 0 : index
    %168 = vector.load %arg5[%c0_144, %c0_145, %c0_146] : memref<4x64x32xbf16, #tpu.memory_space<vmem>>, vector<1x64x32xbf16>
    %169 = vector.shape_cast %168 : vector<1x64x32xbf16> to vector<64x32xbf16>
    %cst_147 = arith.constant dense<0.000000e+00> : vector<20x32xf32>
    %170 = tpu.matmul %167, %169, %cst_147 {dimension_numbers = #tpu.dot_dimension_numbers<[1], [0], [0], [1], [0, 0, 1, 1], [], []>} : vector<20x64xbf16>, vector<64x32xbf16>, vector<20x32xf32> -> vector<20x32xf32>
    %171 = arith.addf %165, %170 : vector<20x32xf32>
    %c1_148 = arith.constant 1 : index
    %c0_149 = arith.constant 0 : index
    %172 = vector.load %arg16[%c1_148, %c0_149] : memref<32x64xf32, #tpu.memory_space<vmem>>, vector<20x64xf32>
    %173 = arith.truncf %172 : vector<20x64xf32> to vector<20x64xbf16>
    %c1_150 = arith.constant 1 : index
    %c0_151 = arith.constant 0 : index
    %c0_152 = arith.constant 0 : index
    %174 = vector.load %arg5[%c1_150, %c0_151, %c0_152] : memref<4x64x32xbf16, #tpu.memory_space<vmem>>, vector<1x64x32xbf16>
    %175 = vector.shape_cast %174 : vector<1x64x32xbf16> to vector<64x32xbf16>
    %cst_153 = arith.constant dense<0.000000e+00> : vector<20x32xf32>
    %176 = tpu.matmul %173, %175, %cst_153 {dimension_numbers = #tpu.dot_dimension_numbers<[1], [0], [0], [1], [0, 0, 1, 1], [], []>} : vector<20x64xbf16>, vector<64x32xbf16>, vector<20x32xf32> -> vector<20x32xf32>
    %177 = arith.addf %171, %176 : vector<20x32xf32>
    %c5_154 = arith.constant 5 : index
    %c0_155 = arith.constant 0 : index
    %178 = vector.load %arg16[%c5_154, %c0_155] : memref<32x64xf32, #tpu.memory_space<vmem>>, vector<20x64xf32>
    %179 = arith.truncf %178 : vector<20x64xf32> to vector<20x64xbf16>
    %c2_156 = arith.constant 2 : index
    %c0_157 = arith.constant 0 : index
    %c0_158 = arith.constant 0 : index
    %180 = vector.load %arg5[%c2_156, %c0_157, %c0_158] : memref<4x64x32xbf16, #tpu.memory_space<vmem>>, vector<1x64x32xbf16>
    %181 = vector.shape_cast %180 : vector<1x64x32xbf16> to vector<64x32xbf16>
    %cst_159 = arith.constant dense<0.000000e+00> : vector<20x32xf32>
    %182 = tpu.matmul %179, %181, %cst_159 {dimension_numbers = #tpu.dot_dimension_numbers<[1], [0], [0], [1], [0, 0, 1, 1], [], []>} : vector<20x64xbf16>, vector<64x32xbf16>, vector<20x32xf32> -> vector<20x32xf32>
    %183 = arith.addf %177, %182 : vector<20x32xf32>
    %c6_160 = arith.constant 6 : index
    %c0_161 = arith.constant 0 : index
    %184 = vector.load %arg16[%c6_160, %c0_161] : memref<32x64xf32, #tpu.memory_space<vmem>>, vector<20x64xf32>
    %185 = arith.truncf %184 : vector<20x64xf32> to vector<20x64xbf16>
    %c3_162 = arith.constant 3 : index
    %c0_163 = arith.constant 0 : index
    %c0_164 = arith.constant 0 : index
    %186 = vector.load %arg5[%c3_162, %c0_163, %c0_164] : memref<4x64x32xbf16, #tpu.memory_space<vmem>>, vector<1x64x32xbf16>
    %187 = vector.shape_cast %186 : vector<1x64x32xbf16> to vector<64x32xbf16>
    %cst_165 = arith.constant dense<0.000000e+00> : vector<20x32xf32>
    %188 = tpu.matmul %185, %187, %cst_165 {dimension_numbers = #tpu.dot_dimension_numbers<[1], [0], [0], [1], [0, 0, 1, 1], [], []>} : vector<20x64xbf16>, vector<64x32xbf16>, vector<20x32xf32> -> vector<20x32xf32>
    %189 = arith.addf %183, %188 : vector<20x32xf32>
    %c0_166 = arith.constant 0 : index
    %c0_167 = arith.constant 0 : index
    %190 = vector.load %arg6[%c0_166, %c0_167] : memref<1x32xf32, #tpu.memory_space<vmem>>, vector<1x32xf32>
    %191 = vector.broadcast %190 : vector<1x32xf32> to vector<20x32xf32>
    %192 = arith.addf %189, %191 : vector<20x32xf32>
    %c0_168 = arith.constant 0 : index
    %c0_169 = arith.constant 0 : index
    %c0_170 = arith.constant 0 : index
    %193 = vector.load %arg2[%c0_168, %c0_169, %c0_170] : memref<1x1x32xf32, #tpu.memory_space<vmem>>, vector<1x1x32xf32>
    %194 = vector.shape_cast %193 : vector<1x1x32xf32> to vector<1x32xf32>
    %195 = arith.truncf %194 : vector<1x32xf32> to vector<1x32xbf16>
    %c0_171 = arith.constant 0 : index
    %c0_172 = arith.constant 0 : index
    %196 = vector.load %arg7[%c0_171, %c0_172] : memref<32x32xbf16, #tpu.memory_space<vmem>>, vector<32x32xbf16>
    %cst_173 = arith.constant dense<0.000000e+00> : vector<1x32xf32>
    %197 = tpu.matmul %195, %196, %cst_173 {dimension_numbers = #tpu.dot_dimension_numbers<[1], [0], [0], [1], [0, 0, 1, 1], [], []>} : vector<1x32xbf16>, vector<32x32xbf16>, vector<1x32xf32> -> vector<1x32xf32>
    %c0_174 = arith.constant 0 : index
    %c0_175 = arith.constant 0 : index
    %198 = vector.load %arg8[%c0_174, %c0_175] : memref<1x32xf32, #tpu.memory_space<vmem>>, vector<1x32xf32>
    %199 = arith.addf %197, %198 : vector<1x32xf32>
    %c0_176 = arith.constant 0 : index
    %c0_177 = arith.constant 0 : index
    %200 = vector.load %arg9[%c0_176, %c0_177] : memref<32x32xbf16, #tpu.memory_space<vmem>>, vector<32x32xbf16>
    %cst_178 = arith.constant dense<0.000000e+00> : vector<1x32xf32>
    %201 = tpu.matmul %195, %200, %cst_178 {dimension_numbers = #tpu.dot_dimension_numbers<[1], [0], [0], [1], [0, 0, 1, 1], [], []>} : vector<1x32xbf16>, vector<32x32xbf16>, vector<1x32xf32> -> vector<1x32xf32>
    %c0_179 = arith.constant 0 : index
    %c0_180 = arith.constant 0 : index
    %202 = vector.load %arg10[%c0_179, %c0_180] : memref<1x32xf32, #tpu.memory_space<vmem>>, vector<1x32xf32>
    %203 = arith.addf %201, %202 : vector<1x32xf32>
    %cst_181 = arith.constant 1.000000e+00 : f32
    %204 = vector.broadcast %cst_181 : f32 to vector<1x32xf32>
    %205 = arith.addf %204, %199 : vector<1x32xf32>
    %206 = vector.broadcast %205 : vector<1x32xf32> to vector<20x32xf32>
    %207 = arith.mulf %192, %206 : vector<20x32xf32>
    %208 = vector.broadcast %203 : vector<1x32xf32> to vector<20x32xf32>
    %209 = arith.addf %207, %208 : vector<20x32xf32>
    %cst_182 = arith.constant 2.000000e-01 : f32
    %210 = vector.broadcast %cst_182 : f32 to vector<20x32xf32>
    %211 = arith.mulf %210, %209 : vector<20x32xf32>
    %212 = arith.maximumf %209, %211 : vector<20x32xf32>
    %213 = vector.extract_strided_slice %212 {offsets = [0, 0], sizes = [1, 32], strides = [1, 1]} : vector<20x32xf32> to vector<1x32xf32>
    %c0_183 = arith.constant 0 : index
    %c96 = arith.constant 96 : index
    %214 = vector.load %arg17[%c0_183, %c96] : memref<16x128xf32, #tpu.memory_space<vmem>>, vector<1x32xf32>
    tpu.vector_store %arg17[%c0_183, %c96], %213 {strides = array<i32>} : memref<16x128xf32, #tpu.memory_space<vmem>>, vector<1x32xf32>,
    %215 = vector.extract_strided_slice %212 {offsets = [1, 0], sizes = [1, 32], strides = [1, 1]} : vector<20x32xf32> to vector<1x32xf32>
    %c1_184 = arith.constant 1 : index
    %c64 = arith.constant 64 : index
    %216 = vector.load %arg17[%c1_184, %c64] : memref<16x128xf32, #tpu.memory_space<vmem>>, vector<1x32xf32>
    tpu.vector_store %arg17[%c1_184, %c64], %215 {strides = array<i32>} : memref<16x128xf32, #tpu.memory_space<vmem>>, vector<1x32xf32>,
    %217 = vector.extract_strided_slice %212 {offsets = [2, 0], sizes = [1, 32], strides = [1, 1]} : vector<20x32xf32> to vector<1x32xf32>
    %c1_185 = arith.constant 1 : index
    %c96_186 = arith.constant 96 : index
    %218 = vector.load %arg17[%c1_185, %c96_186] : memref<16x128xf32, #tpu.memory_space<vmem>>, vector<1x32xf32>
    tpu.vector_store %arg17[%c1_185, %c96_186], %217 {strides = array<i32>} : memref<16x128xf32, #tpu.memory_space<vmem>>, vector<1x32xf32>,
    %219 = vector.extract_strided_slice %212 {offsets = [3, 0], sizes = [1, 32], strides = [1, 1]} : vector<20x32xf32> to vector<1x32xf32>
    %c2_187 = arith.constant 2 : index
    %c64_188 = arith.constant 64 : index
    %220 = vector.load %arg17[%c2_187, %c64_188] : memref<16x128xf32, #tpu.memory_space<vmem>>, vector<1x32xf32>
    tpu.vector_store %arg17[%c2_187, %c64_188], %219 {strides = array<i32>} : memref<16x128xf32, #tpu.memory_space<vmem>>, vector<1x32xf32>,
    %221 = vector.extract_strided_slice %212 {offsets = [5, 0], sizes = [1, 32], strides = [1, 1]} : vector<20x32xf32> to vector<1x32xf32>
    %c3_189 = arith.constant 3 : index
    %c32_190 = arith.constant 32 : index
    %222 = vector.load %arg17[%c3_189, %c32_190] : memref<16x128xf32, #tpu.memory_space<vmem>>, vector<1x32xf32>
    tpu.vector_store %arg17[%c3_189, %c32_190], %221 {strides = array<i32>} : memref<16x128xf32, #tpu.memory_space<vmem>>, vector<1x32xf32>,
    %223 = vector.extract_strided_slice %212 {offsets = [6, 0], sizes = [1, 32], strides = [1, 1]} : vector<20x32xf32> to vector<1x32xf32>
    %c4_191 = arith.constant 4 : index
    %c0_192 = arith.constant 0 : index
    %224 = vector.load %arg17[%c4_191, %c0_192] : memref<16x128xf32, #tpu.memory_space<vmem>>, vector<1x32xf32>
    tpu.vector_store %arg17[%c4_191, %c0_192], %223 {strides = array<i32>} : memref<16x128xf32, #tpu.memory_space<vmem>>, vector<1x32xf32>,
    %225 = vector.extract_strided_slice %212 {offsets = [7, 0], sizes = [1, 32], strides = [1, 1]} : vector<20x32xf32> to vector<1x32xf32>
    %c4_193 = arith.constant 4 : index
    %c32_194 = arith.constant 32 : index
    %226 = vector.load %arg17[%c4_193, %c32_194] : memref<16x128xf32, #tpu.memory_space<vmem>>, vector<1x32xf32>
    tpu.vector_store %arg17[%c4_193, %c32_194], %225 {strides = array<i32>} : memref<16x128xf32, #tpu.memory_space<vmem>>, vector<1x32xf32>,
    %227 = vector.extract_strided_slice %212 {offsets = [8, 0], sizes = [1, 32], strides = [1, 1]} : vector<20x32xf32> to vector<1x32xf32>
    %c5_195 = arith.constant 5 : index
    %c0_196 = arith.constant 0 : index
    %228 = vector.load %arg17[%c5_195, %c0_196] : memref<16x128xf32, #tpu.memory_space<vmem>>, vector<1x32xf32>
    tpu.vector_store %arg17[%c5_195, %c0_196], %227 {strides = array<i32>} : memref<16x128xf32, #tpu.memory_space<vmem>>, vector<1x32xf32>,
    %229 = vector.extract_strided_slice %212 {offsets = [10, 0], sizes = [1, 32], strides = [1, 1]} : vector<20x32xf32> to vector<1x32xf32>
    %c3_197 = arith.constant 3 : index
    %c96_198 = arith.constant 96 : index
    %230 = vector.load %arg17[%c3_197, %c96_198] : memref<16x128xf32, #tpu.memory_space<vmem>>, vector<1x32xf32>
    tpu.vector_store %arg17[%c3_197, %c96_198], %229 {strides = array<i32>} : memref<16x128xf32, #tpu.memory_space<vmem>>, vector<1x32xf32>,
    %231 = vector.extract_strided_slice %212 {offsets = [11, 0], sizes = [1, 32], strides = [1, 1]} : vector<20x32xf32> to vector<1x32xf32>
    %c4_199 = arith.constant 4 : index
    %c64_200 = arith.constant 64 : index
    %232 = vector.load %arg17[%c4_199, %c64_200] : memref<16x128xf32, #tpu.memory_space<vmem>>, vector<1x32xf32>
    tpu.vector_store %arg17[%c4_199, %c64_200], %231 {strides = array<i32>} : memref<16x128xf32, #tpu.memory_space<vmem>>, vector<1x32xf32>,
    %233 = vector.extract_strided_slice %212 {offsets = [12, 0], sizes = [1, 32], strides = [1, 1]} : vector<20x32xf32> to vector<1x32xf32>
    %c4_201 = arith.constant 4 : index
    %c96_202 = arith.constant 96 : index
    %234 = vector.load %arg17[%c4_201, %c96_202] : memref<16x128xf32, #tpu.memory_space<vmem>>, vector<1x32xf32>
    tpu.vector_store %arg17[%c4_201, %c96_202], %233 {strides = array<i32>} : memref<16x128xf32, #tpu.memory_space<vmem>>, vector<1x32xf32>,
    %235 = vector.extract_strided_slice %212 {offsets = [13, 0], sizes = [1, 32], strides = [1, 1]} : vector<20x32xf32> to vector<1x32xf32>
    %c5_203 = arith.constant 5 : index
    %c64_204 = arith.constant 64 : index
    %236 = vector.load %arg17[%c5_203, %c64_204] : memref<16x128xf32, #tpu.memory_space<vmem>>, vector<1x32xf32>
    tpu.vector_store %arg17[%c5_203, %c64_204], %235 {strides = array<i32>} : memref<16x128xf32, #tpu.memory_space<vmem>>, vector<1x32xf32>,
    %237 = vector.extract_strided_slice %212 {offsets = [15, 0], sizes = [1, 32], strides = [1, 1]} : vector<20x32xf32> to vector<1x32xf32>
    %c6_205 = arith.constant 6 : index
    %c32_206 = arith.constant 32 : index
    %238 = vector.load %arg17[%c6_205, %c32_206] : memref<16x128xf32, #tpu.memory_space<vmem>>, vector<1x32xf32>
    tpu.vector_store %arg17[%c6_205, %c32_206], %237 {strides = array<i32>} : memref<16x128xf32, #tpu.memory_space<vmem>>, vector<1x32xf32>,
    %239 = vector.extract_strided_slice %212 {offsets = [16, 0], sizes = [1, 32], strides = [1, 1]} : vector<20x32xf32> to vector<1x32xf32>
    %c7_207 = arith.constant 7 : index
    %c0_208 = arith.constant 0 : index
    %240 = vector.load %arg17[%c7_207, %c0_208] : memref<16x128xf32, #tpu.memory_space<vmem>>, vector<1x32xf32>
    tpu.vector_store %arg17[%c7_207, %c0_208], %239 {strides = array<i32>} : memref<16x128xf32, #tpu.memory_space<vmem>>, vector<1x32xf32>,
    %241 = vector.extract_strided_slice %212 {offsets = [17, 0], sizes = [1, 32], strides = [1, 1]} : vector<20x32xf32> to vector<1x32xf32>
    %c7_209 = arith.constant 7 : index
    %c32_210 = arith.constant 32 : index
    %242 = vector.load %arg17[%c7_209, %c32_210] : memref<16x128xf32, #tpu.memory_space<vmem>>, vector<1x32xf32>
    tpu.vector_store %arg17[%c7_209, %c32_210], %241 {strides = array<i32>} : memref<16x128xf32, #tpu.memory_space<vmem>>, vector<1x32xf32>,
    %243 = vector.extract_strided_slice %212 {offsets = [18, 0], sizes = [1, 32], strides = [1, 1]} : vector<20x32xf32> to vector<1x32xf32>
    %c8_211 = arith.constant 8 : index
    %c0_212 = arith.constant 0 : index
    %244 = vector.load %arg17[%c8_211, %c0_212] : memref<16x128xf32, #tpu.memory_space<vmem>>, vector<1x32xf32>
    tpu.vector_store %arg17[%c8_211, %c0_212], %243 {strides = array<i32>} : memref<16x128xf32, #tpu.memory_space<vmem>>, vector<1x32xf32>,
    %cst_213 = arith.constant 0.000000e+00 : f32
    %245 = vector.broadcast %cst_213 : f32 to vector<6x64xf32>
    %c0_214 = arith.constant 0 : index
    %c0_215 = arith.constant 0 : index
    %246 = vector.load %arg17[%c0_214, %c0_215] : memref<16x128xf32, #tpu.memory_space<vmem>>, vector<6x128xf32>
    %247 = arith.truncf %246 : vector<6x128xf32> to vector<6x128xbf16>
    %c0_216 = arith.constant 0 : index
    %c0_217 = arith.constant 0 : index
    %c0_218 = arith.constant 0 : index
    %248 = vector.load %arg11[%c0_216, %c0_217, %c0_218] : memref<4x128x64xbf16, #tpu.memory_space<vmem>>, vector<1x128x64xbf16>
    %249 = vector.shape_cast %248 : vector<1x128x64xbf16> to vector<128x64xbf16>
    %cst_219 = arith.constant dense<0.000000e+00> : vector<6x64xf32>
    %250 = tpu.matmul %247, %249, %cst_219 {dimension_numbers = #tpu.dot_dimension_numbers<[1], [0], [0], [1], [0, 0, 1, 1], [], []>} : vector<6x128xbf16>, vector<128x64xbf16>, vector<6x64xf32> -> vector<6x64xf32>
    %251 = arith.addf %245, %250 : vector<6x64xf32>
    %c1_220 = arith.constant 1 : index
    %c0_221 = arith.constant 0 : index
    %252 = vector.load %arg17[%c1_220, %c0_221] : memref<16x128xf32, #tpu.memory_space<vmem>>, vector<6x128xf32>
    %253 = arith.truncf %252 : vector<6x128xf32> to vector<6x128xbf16>
    %c1_222 = arith.constant 1 : index
    %c0_223 = arith.constant 0 : index
    %c0_224 = arith.constant 0 : index
    %254 = vector.load %arg11[%c1_222, %c0_223, %c0_224] : memref<4x128x64xbf16, #tpu.memory_space<vmem>>, vector<1x128x64xbf16>
    %255 = vector.shape_cast %254 : vector<1x128x64xbf16> to vector<128x64xbf16>
    %cst_225 = arith.constant dense<0.000000e+00> : vector<6x64xf32>
    %256 = tpu.matmul %253, %255, %cst_225 {dimension_numbers = #tpu.dot_dimension_numbers<[1], [0], [0], [1], [0, 0, 1, 1], [], []>} : vector<6x128xbf16>, vector<128x64xbf16>, vector<6x64xf32> -> vector<6x64xf32>
    %257 = arith.addf %251, %256 : vector<6x64xf32>
    %c3_226 = arith.constant 3 : index
    %c0_227 = arith.constant 0 : index
    %258 = vector.load %arg17[%c3_226, %c0_227] : memref<16x128xf32, #tpu.memory_space<vmem>>, vector<6x128xf32>
    %259 = arith.truncf %258 : vector<6x128xf32> to vector<6x128xbf16>
    %c2_228 = arith.constant 2 : index
    %c0_229 = arith.constant 0 : index
    %c0_230 = arith.constant 0 : index
    %260 = vector.load %arg11[%c2_228, %c0_229, %c0_230] : memref<4x128x64xbf16, #tpu.memory_space<vmem>>, vector<1x128x64xbf16>
    %261 = vector.shape_cast %260 : vector<1x128x64xbf16> to vector<128x64xbf16>
    %cst_231 = arith.constant dense<0.000000e+00> : vector<6x64xf32>
    %262 = tpu.matmul %259, %261, %cst_231 {dimension_numbers = #tpu.dot_dimension_numbers<[1], [0], [0], [1], [0, 0, 1, 1], [], []>} : vector<6x128xbf16>, vector<128x64xbf16>, vector<6x64xf32> -> vector<6x64xf32>
    %263 = arith.addf %257, %262 : vector<6x64xf32>
    %c4_232 = arith.constant 4 : index
    %c0_233 = arith.constant 0 : index
    %264 = vector.load %arg17[%c4_232, %c0_233] : memref<16x128xf32, #tpu.memory_space<vmem>>, vector<6x128xf32>
    %265 = arith.truncf %264 : vector<6x128xf32> to vector<6x128xbf16>
    %c3_234 = arith.constant 3 : index
    %c0_235 = arith.constant 0 : index
    %c0_236 = arith.constant 0 : index
    %266 = vector.load %arg11[%c3_234, %c0_235, %c0_236] : memref<4x128x64xbf16, #tpu.memory_space<vmem>>, vector<1x128x64xbf16>
    %267 = vector.shape_cast %266 : vector<1x128x64xbf16> to vector<128x64xbf16>
    %cst_237 = arith.constant dense<0.000000e+00> : vector<6x64xf32>
    %268 = tpu.matmul %265, %267, %cst_237 {dimension_numbers = #tpu.dot_dimension_numbers<[1], [0], [0], [1], [0, 0, 1, 1], [], []>} : vector<6x128xbf16>, vector<128x64xbf16>, vector<6x64xf32> -> vector<6x64xf32>
    %269 = arith.addf %263, %268 : vector<6x64xf32>
    %c0_238 = arith.constant 0 : index
    %c0_239 = arith.constant 0 : index
    %270 = vector.load %arg12[%c0_238, %c0_239] : memref<1x64xf32, #tpu.memory_space<vmem>>, vector<1x64xf32>
    %271 = vector.broadcast %270 : vector<1x64xf32> to vector<6x64xf32>
    %272 = arith.addf %269, %271 : vector<6x64xf32>
    %cst_240 = arith.constant 2.000000e-01 : f32
    %273 = vector.broadcast %cst_240 : f32 to vector<6x64xf32>
    %274 = arith.mulf %273, %272 : vector<6x64xf32>
    %275 = arith.maximumf %272, %274 : vector<6x64xf32>
    %276 = vector.extract_strided_slice %275 {offsets = [0, 0], sizes = [2, 64], strides = [1, 1]} : vector<6x64xf32> to vector<2x64xf32>
    %c5_241 = arith.constant 5 : index
    %c0_242 = arith.constant 0 : index
    %277 = vector.load %arg18[%c5_241, %c0_242] : memref<24x64xf32, #tpu.memory_space<vmem>>, vector<2x64xf32>
    tpu.vector_store %arg18[%c5_241, %c0_242], %276 {strides = array<i32>} : memref<24x64xf32, #tpu.memory_space<vmem>>, vector<2x64xf32>,
    %278 = vector.extract_strided_slice %275 {offsets = [3, 0], sizes = [2, 64], strides = [1, 1]} : vector<6x64xf32> to vector<2x64xf32>
    %c9_243 = arith.constant 9 : index
    %c0_244 = arith.constant 0 : index
    %279 = vector.load %arg18[%c9_243, %c0_244] : memref<24x64xf32, #tpu.memory_space<vmem>>, vector<2x64xf32>
    tpu.vector_store %arg18[%c9_243, %c0_244], %278 {strides = array<i32>} : memref<24x64xf32, #tpu.memory_space<vmem>>, vector<2x64xf32>,
    %cst_245 = arith.constant 0.000000e+00 : f32
    %280 = vector.broadcast %cst_245 : f32 to vector<8x128xf32>
    %c0_246 = arith.constant 0 : index
    %c0_247 = arith.constant 0 : index
    %281 = vector.load %arg18[%c0_246, %c0_247] : memref<24x64xf32, #tpu.memory_space<vmem>>, vector<8x64xf32>
    %282 = arith.truncf %281 : vector<8x64xf32> to vector<8x64xbf16>
    %c0_248 = arith.constant 0 : index
    %c0_249 = arith.constant 0 : index
    %c0_250 = arith.constant 0 : index
    %283 = vector.load %arg13[%c0_248, %c0_249, %c0_250] : memref<9x64x128xbf16, #tpu.memory_space<vmem>>, vector<1x64x128xbf16>
    %284 = vector.shape_cast %283 : vector<1x64x128xbf16> to vector<64x128xbf16>
    %cst_251 = arith.constant dense<0.000000e+00> : vector<8x128xf32>
    %285 = tpu.matmul %282, %284, %cst_251 {dimension_numbers = #tpu.dot_dimension_numbers<[1], [0], [0], [1], [0, 0, 1, 1], [], []>} : vector<8x64xbf16>, vector<64x128xbf16>, vector<8x128xf32> -> vector<8x128xf32>
    %286 = arith.addf %280, %285 : vector<8x128xf32>
    %c1_252 = arith.constant 1 : index
    %c0_253 = arith.constant 0 : index
    %287 = vector.load %arg18[%c1_252, %c0_253] : memref<24x64xf32, #tpu.memory_space<vmem>>, vector<8x64xf32>
    %288 = arith.truncf %287 : vector<8x64xf32> to vector<8x64xbf16>
    %c1_254 = arith.constant 1 : index
    %c0_255 = arith.constant 0 : index
    %c0_256 = arith.constant 0 : index
    %289 = vector.load %arg13[%c1_254, %c0_255, %c0_256] : memref<9x64x128xbf16, #tpu.memory_space<vmem>>, vector<1x64x128xbf16>
    %290 = vector.shape_cast %289 : vector<1x64x128xbf16> to vector<64x128xbf16>
    %cst_257 = arith.constant dense<0.000000e+00> : vector<8x128xf32>
    %291 = tpu.matmul %288, %290, %cst_257 {dimension_numbers = #tpu.dot_dimension_numbers<[1], [0], [0], [1], [0, 0, 1, 1], [], []>} : vector<8x64xbf16>, vector<64x128xbf16>, vector<8x128xf32> -> vector<8x128xf32>
    %292 = arith.addf %286, %291 : vector<8x128xf32>
    %c2_258 = arith.constant 2 : index
    %c0_259 = arith.constant 0 : index
    %293 = vector.load %arg18[%c2_258, %c0_259] : memref<24x64xf32, #tpu.memory_space<vmem>>, vector<8x64xf32>
    %294 = arith.truncf %293 : vector<8x64xf32> to vector<8x64xbf16>
    %c2_260 = arith.constant 2 : index
    %c0_261 = arith.constant 0 : index
    %c0_262 = arith.constant 0 : index
    %295 = vector.load %arg13[%c2_260, %c0_261, %c0_262] : memref<9x64x128xbf16, #tpu.memory_space<vmem>>, vector<1x64x128xbf16>
    %296 = vector.shape_cast %295 : vector<1x64x128xbf16> to vector<64x128xbf16>
    %cst_263 = arith.constant dense<0.000000e+00> : vector<8x128xf32>
    %297 = tpu.matmul %294, %296, %cst_263 {dimension_numbers = #tpu.dot_dimension_numbers<[1], [0], [0], [1], [0, 0, 1, 1], [], []>} : vector<8x64xbf16>, vector<64x128xbf16>, vector<8x128xf32> -> vector<8x128xf32>
    %298 = arith.addf %292, %297 : vector<8x128xf32>
    %c4_264 = arith.constant 4 : index
    %c0_265 = arith.constant 0 : index
    %299 = vector.load %arg18[%c4_264, %c0_265] : memref<24x64xf32, #tpu.memory_space<vmem>>, vector<8x64xf32>
    %300 = arith.truncf %299 : vector<8x64xf32> to vector<8x64xbf16>
    %c3_266 = arith.constant 3 : index
    %c0_267 = arith.constant 0 : index
    %c0_268 = arith.constant 0 : index
    %301 = vector.load %arg13[%c3_266, %c0_267, %c0_268] : memref<9x64x128xbf16, #tpu.memory_space<vmem>>, vector<1x64x128xbf16>
    %302 = vector.shape_cast %301 : vector<1x64x128xbf16> to vector<64x128xbf16>
    %cst_269 = arith.constant dense<0.000000e+00> : vector<8x128xf32>
    %303 = tpu.matmul %300, %302, %cst_269 {dimension_numbers = #tpu.dot_dimension_numbers<[1], [0], [0], [1], [0, 0, 1, 1], [], []>} : vector<8x64xbf16>, vector<64x128xbf16>, vector<8x128xf32> -> vector<8x128xf32>
    %304 = arith.addf %298, %303 : vector<8x128xf32>
    %c5_270 = arith.constant 5 : index
    %c0_271 = arith.constant 0 : index
    %305 = vector.load %arg18[%c5_270, %c0_271] : memref<24x64xf32, #tpu.memory_space<vmem>>, vector<8x64xf32>
    %306 = arith.truncf %305 : vector<8x64xf32> to vector<8x64xbf16>
    %c4_272 = arith.constant 4 : index
    %c0_273 = arith.constant 0 : index
    %c0_274 = arith.constant 0 : index
    %307 = vector.load %arg13[%c4_272, %c0_273, %c0_274] : memref<9x64x128xbf16, #tpu.memory_space<vmem>>, vector<1x64x128xbf16>
    %308 = vector.shape_cast %307 : vector<1x64x128xbf16> to vector<64x128xbf16>
    %cst_275 = arith.constant dense<0.000000e+00> : vector<8x128xf32>
    %309 = tpu.matmul %306, %308, %cst_275 {dimension_numbers = #tpu.dot_dimension_numbers<[1], [0], [0], [1], [0, 0, 1, 1], [], []>} : vector<8x64xbf16>, vector<64x128xbf16>, vector<8x128xf32> -> vector<8x128xf32>
    %310 = arith.addf %304, %309 : vector<8x128xf32>
    %c6_276 = arith.constant 6 : index
    %c0_277 = arith.constant 0 : index
    %311 = vector.load %arg18[%c6_276, %c0_277] : memref<24x64xf32, #tpu.memory_space<vmem>>, vector<8x64xf32>
    %312 = arith.truncf %311 : vector<8x64xf32> to vector<8x64xbf16>
    %c5_278 = arith.constant 5 : index
    %c0_279 = arith.constant 0 : index
    %c0_280 = arith.constant 0 : index
    %313 = vector.load %arg13[%c5_278, %c0_279, %c0_280] : memref<9x64x128xbf16, #tpu.memory_space<vmem>>, vector<1x64x128xbf16>
    %314 = vector.shape_cast %313 : vector<1x64x128xbf16> to vector<64x128xbf16>
    %cst_281 = arith.constant dense<0.000000e+00> : vector<8x128xf32>
    %315 = tpu.matmul %312, %314, %cst_281 {dimension_numbers = #tpu.dot_dimension_numbers<[1], [0], [0], [1], [0, 0, 1, 1], [], []>} : vector<8x64xbf16>, vector<64x128xbf16>, vector<8x128xf32> -> vector<8x128xf32>
    %316 = arith.addf %310, %315 : vector<8x128xf32>
    %c8_282 = arith.constant 8 : index
    %c0_283 = arith.constant 0 : index
    %317 = vector.load %arg18[%c8_282, %c0_283] : memref<24x64xf32, #tpu.memory_space<vmem>>, vector<8x64xf32>
    %318 = arith.truncf %317 : vector<8x64xf32> to vector<8x64xbf16>
    %c6_284 = arith.constant 6 : index
    %c0_285 = arith.constant 0 : index
    %c0_286 = arith.constant 0 : index
    %319 = vector.load %arg13[%c6_284, %c0_285, %c0_286] : memref<9x64x128xbf16, #tpu.memory_space<vmem>>, vector<1x64x128xbf16>
    %320 = vector.shape_cast %319 : vector<1x64x128xbf16> to vector<64x128xbf16>
    %cst_287 = arith.constant dense<0.000000e+00> : vector<8x128xf32>
    %321 = tpu.matmul %318, %320, %cst_287 {dimension_numbers = #tpu.dot_dimension_numbers<[1], [0], [0], [1], [0, 0, 1, 1], [], []>} : vector<8x64xbf16>, vector<64x128xbf16>, vector<8x128xf32> -> vector<8x128xf32>
    %322 = arith.addf %316, %321 : vector<8x128xf32>
    %c9_288 = arith.constant 9 : index
    %c0_289 = arith.constant 0 : index
    %323 = vector.load %arg18[%c9_288, %c0_289] : memref<24x64xf32, #tpu.memory_space<vmem>>, vector<8x64xf32>
    %324 = arith.truncf %323 : vector<8x64xf32> to vector<8x64xbf16>
    %c7_290 = arith.constant 7 : index
    %c0_291 = arith.constant 0 : index
    %c0_292 = arith.constant 0 : index
    %325 = vector.load %arg13[%c7_290, %c0_291, %c0_292] : memref<9x64x128xbf16, #tpu.memory_space<vmem>>, vector<1x64x128xbf16>
    %326 = vector.shape_cast %325 : vector<1x64x128xbf16> to vector<64x128xbf16>
    %cst_293 = arith.constant dense<0.000000e+00> : vector<8x128xf32>
    %327 = tpu.matmul %324, %326, %cst_293 {dimension_numbers = #tpu.dot_dimension_numbers<[1], [0], [0], [1], [0, 0, 1, 1], [], []>} : vector<8x64xbf16>, vector<64x128xbf16>, vector<8x128xf32> -> vector<8x128xf32>
    %328 = arith.addf %322, %327 : vector<8x128xf32>
    %c10_294 = arith.constant 10 : index
    %c0_295 = arith.constant 0 : index
    %329 = vector.load %arg18[%c10_294, %c0_295] : memref<24x64xf32, #tpu.memory_space<vmem>>, vector<8x64xf32>
    %330 = arith.truncf %329 : vector<8x64xf32> to vector<8x64xbf16>
    %c8_296 = arith.constant 8 : index
    %c0_297 = arith.constant 0 : index
    %c0_298 = arith.constant 0 : index
    %331 = vector.load %arg13[%c8_296, %c0_297, %c0_298] : memref<9x64x128xbf16, #tpu.memory_space<vmem>>, vector<1x64x128xbf16>
    %332 = vector.shape_cast %331 : vector<1x64x128xbf16> to vector<64x128xbf16>
    %cst_299 = arith.constant dense<0.000000e+00> : vector<8x128xf32>
    %333 = tpu.matmul %330, %332, %cst_299 {dimension_numbers = #tpu.dot_dimension_numbers<[1], [0], [0], [1], [0, 0, 1, 1], [], []>} : vector<8x64xbf16>, vector<64x128xbf16>, vector<8x128xf32> -> vector<8x128xf32>
    %334 = arith.addf %328, %333 : vector<8x128xf32>
    %c0_300 = arith.constant 0 : index
    %c0_301 = arith.constant 0 : index
    %335 = vector.load %arg14[%c0_300, %c0_301] : memref<1x128xf32, #tpu.memory_space<vmem>>, vector<1x128xf32>
    %336 = vector.broadcast %335 : vector<1x128xf32> to vector<8x128xf32>
    %337 = arith.addf %334, %336 : vector<8x128xf32>
    %c0_302 = arith.constant 0 : index
    %c0_303 = arith.constant 0 : index
    %c0_304 = arith.constant 0 : index
    %338 = vector.load %arg15[%c0_302, %c0_303, %c0_304] : memref<1x8x128xf32, #tpu.memory_space<vmem>>, vector<1x8x128xf32>
    %339 = vector.shape_cast %338 : vector<1x8x128xf32> to vector<8x128xf32>
    %340 = vector.shape_cast %337 : vector<8x128xf32> to vector<1x8x128xf32>
    tpu.vector_store %arg15[%c0_302, %c0_303, %c0_304], %340 {strides = array<i32>} : memref<1x8x128xf32, #tpu.memory_space<vmem>>, vector<1x8x128xf32>,
    return
  }
  func.func @transform_0(%arg0: i32) -> (i32, i32, i32) {
    %c0_i32 = arith.constant 0 : i32
    %c0_i32_0 = arith.constant 0 : i32
    %c0_i32_1 = arith.constant 0 : i32
    return %arg0, %c0_i32, %c0_i32_0 : i32, i32, i32
  }
  func.func @transform_1(%arg0: i32) -> (i32, i32, i32) {
    %c0_i32 = arith.constant 0 : i32
    %c0_i32_0 = arith.constant 0 : i32
    %c0_i32_1 = arith.constant 0 : i32
    return %arg0, %c0_i32, %c0_i32_0 : i32, i32, i32
  }
  func.func @transform_2(%arg0: i32) -> (i32, i32, i32) {
    %c0_i32 = arith.constant 0 : i32
    %c0_i32_0 = arith.constant 0 : i32
    %c0_i32_1 = arith.constant 0 : i32
    %c0_i32_2 = arith.constant 0 : i32
    return %c0_i32, %c0_i32_0, %c0_i32_1 : i32, i32, i32
  }
  func.func @transform_3(%arg0: i32) -> (i32, i32) {
    %c0_i32 = arith.constant 0 : i32
    %c0_i32_0 = arith.constant 0 : i32
    %c0_i32_1 = arith.constant 0 : i32
    return %c0_i32, %c0_i32_0 : i32, i32
  }
  func.func @transform_4(%arg0: i32) -> (i32, i32, i32) {
    %c0_i32 = arith.constant 0 : i32
    %c0_i32_0 = arith.constant 0 : i32
    %c0_i32_1 = arith.constant 0 : i32
    %c0_i32_2 = arith.constant 0 : i32
    return %c0_i32, %c0_i32_0, %c0_i32_1 : i32, i32, i32
  }
  func.func @transform_5(%arg0: i32) -> (i32, i32) {
    %c0_i32 = arith.constant 0 : i32
    %c0_i32_0 = arith.constant 0 : i32
    %c0_i32_1 = arith.constant 0 : i32
    return %c0_i32, %c0_i32_0 : i32, i32
  }
  func.func @transform_6(%arg0: i32) -> (i32, i32) {
    %c0_i32 = arith.constant 0 : i32
    %c0_i32_0 = arith.constant 0 : i32
    %c0_i32_1 = arith.constant 0 : i32
    return %c0_i32, %c0_i32_0 : i32, i32
  }
  func.func @transform_7(%arg0: i32) -> (i32, i32) {
    %c0_i32 = arith.constant 0 : i32
    %c0_i32_0 = arith.constant 0 : i32
    %c0_i32_1 = arith.constant 0 : i32
    return %c0_i32, %c0_i32_0 : i32, i32
  }
  func.func @transform_8(%arg0: i32) -> (i32, i32) {
    %c0_i32 = arith.constant 0 : i32
    %c0_i32_0 = arith.constant 0 : i32
    %c0_i32_1 = arith.constant 0 : i32
    return %c0_i32, %c0_i32_0 : i32, i32
  }
  func.func @transform_9(%arg0: i32) -> (i32, i32) {
    %c0_i32 = arith.constant 0 : i32
    %c0_i32_0 = arith.constant 0 : i32
    %c0_i32_1 = arith.constant 0 : i32
    return %c0_i32, %c0_i32_0 : i32, i32
  }
  func.func @transform_10(%arg0: i32) -> (i32, i32, i32) {
    %c0_i32 = arith.constant 0 : i32
    %c0_i32_0 = arith.constant 0 : i32
    %c0_i32_1 = arith.constant 0 : i32
    %c0_i32_2 = arith.constant 0 : i32
    return %c0_i32, %c0_i32_0, %c0_i32_1 : i32, i32, i32
  }
  func.func @transform_11(%arg0: i32) -> (i32, i32) {
    %c0_i32 = arith.constant 0 : i32
    %c0_i32_0 = arith.constant 0 : i32
    %c0_i32_1 = arith.constant 0 : i32
    return %c0_i32, %c0_i32_0 : i32, i32
  }
  func.func @transform_12(%arg0: i32) -> (i32, i32, i32) {
    %c0_i32 = arith.constant 0 : i32
    %c0_i32_0 = arith.constant 0 : i32
    %c0_i32_1 = arith.constant 0 : i32
    %c0_i32_2 = arith.constant 0 : i32
    return %c0_i32, %c0_i32_0, %c0_i32_1 : i32, i32, i32
  }
  func.func @transform_13(%arg0: i32) -> (i32, i32) {
    %c0_i32 = arith.constant 0 : i32
    %c0_i32_0 = arith.constant 0 : i32
    %c0_i32_1 = arith.constant 0 : i32
    return %c0_i32, %c0_i32_0 : i32, i32
  }
  func.func @transform_14(%arg0: i32) -> (i32, i32, i32) {
    %c0_i32 = arith.constant 0 : i32
    %c0_i32_0 = arith.constant 0 : i32
    %c0_i32_1 = arith.constant 0 : i32
    return %arg0, %c0_i32, %c0_i32_0 : i32, i32, i32
  }
}

</mosaic_0001>

<bundles_post_ra>
// kernel: squeeze.1
= control target key start
LH: loop header
LB: loop body
LE: loop exit
PB: predicated region body
PF: predicated region fallthrough
CT: control target
= control target key end

     0   :  { %vm7_vm0 = vcmask 31744   ;;  %s49_s0 = inlined_call_operand.vmem [shape: f32[2,8], index: 0, kind: input, shape index: {}]   ;;  %s50_s1 = inlined_call_operand.vmem [shape: f32[2,2,4], index: 1, kind: output, shape index: {}]  }
   0x1   :  { %v4_v0 = vld [vmem:[%s49_s0] sm:$0x3]  ;;  %s29_s0 = smov 124  }
   0x2   :  { %5 = vst [vmem:[#allocation1] sm:$0x3] %v4_v0 }
   0x9   :  { %v9_v1 = vld [vmem:[#allocation1] sm:$0x3]  }
   0xa   :  { %v6_v2 = vld [vmem:[#allocation1] sm:$0x3]   ;;  %10 = vrot.lane.b32.xlu0 %v9_v1, %s29_s0 }
   0xb   :  { %8 = vst.msk [vmem:[#allocation0] ss:$8 sm:$0x3] %vm7_vm0, %v6_v2  }
  0x7c   :  { %v11_v3 = vpop.permute.xlu0 %10  }
  0x7d   :  { %14 = vst.msk [vmem:[#allocation0 + $0x1] ss:$8 sm:$0x3] %vm7_vm0, %v11_v3  }
  0x84   :  { %v17_v4 = vld [vmem:[#allocation0] sm:$0x3]  ;;  %v22_v5 = vld [vmem:[#allocation0 + $0x8] sm:$0x3] }
  0x85   :  { %20 = vst [vmem:[%s50_s1] sm:$0x3] %v17_v4 }
  0x86   :  { %27 = vst [vmem:[%s50_s1 + $0x2] sm:$0x3] %v22_v5 }

// kernel: discriminator_forward.1
= control target key start
LH: loop header
LB: loop body
LE: loop exit
PB: predicated region body
PF: predicated region fallthrough
CT: control target
= control target key end

     0   :  { %s3148_s29 = smov 0   ;;  %s3656_s0 = inlined_call_operand.vmem [shape: bf16[2,88,12], index: 0, kind: input, shape index: {}]   ;;  %s3657_s1 = inlined_call_operand.vmem [shape: f32[2,1,32], index: 1, kind: input, shape index: {}]   ;;  %s3658_s2 = inlined_call_operand.vmem [shape: bf16[4,12,16], index: 2, kind: input, shape index: {}]   ;;  %s3659_s3 = inlined_call_operand.vmem [shape: f32[1,16], index: 3, kind: input, shape index: {}]   ;;  %s3660_s4 = inlined_call_operand.vmem [shape: bf16[4,64,32], index: 4, kind: input, shape index: {}]   ;;  %s3661_s5 = inlined_call_operand.vmem [shape: f32[1,32], index: 5, kind: input, shape index: {}]   ;;  %s3662_s6 = inlined_call_operand.vmem [shape: bf16[32,32], index: 6, kind: input, shape index: {}]   ;;  %s3663_s7 = inlined_call_operand.vmem [shape: f32[1,32], index: 7, kind: input, shape index: {}]   ;;  %s3664_s8 = inlined_call_operand.vmem [shape: bf16[32,32], index: 8, kind: input, shape index: {}]   ;;  %s3665_s9 = inlined_call_operand.vmem [shape: f32[1,32], index: 9, kind: input, shape index: {}]   ;;  %s3666_s10 = inlined_call_operand.vmem [shape: bf16[4,128,64], index: 10, kind: input, shape index: {}]   ;;  %s3667_s11 = inlined_call_operand.vmem [shape: f32[1,64], index: 11, kind: input, shape index: {}]   ;;  %s3668_s12 = inlined_call_operand.vmem [shape: bf16[9,64,128], index: 12, kind: input, shape index: {}]   ;;  %s3669_s13 = inlined_call_operand.vmem [shape: f32[1,128], index: 13, kind: input, shape index: {}]   ;;  %s3670_s14 = inlined_call_operand.vmem [shape: f32[2,8,128], index: 14, kind: output, shape index: {}]  }
   0x1 LB: > { %s2347_s30 = sadd.s32 4294967295, %s3065_s29   ;;  %p2351_p0 = scmp.ge.s32.totalorder %s3065_s29, 1  ;;  %s3065_s29 = sphi %s3148_s29, %s24_s29  }
   0x2   : > { %p420_p1 = scmp.lt.s32.totalorder %s3065_s29, 3 }
   0x4   : > { %p421_p2 = pnand %p2351_p0, %p420_p1 }
   0x5   : > { %p468_p3 = scmp.lt.s32.totalorder (!%p421_p2), %s2347_s30, 1  ;;  %s3068_s23 = smov (!%p421_p2), 48  }
   0x6   : > { %424 = sbr.rel (%p421_p2) target bundleno = 993 (0x3e1), region = 76  ;;  %s3069_s24 = smov (!%p421_p2), 32  }
   0x7   : > { %s3070_s25 = smov (!%p421_p2), 16   ;;  %s3071_s22 = smov (!%p421_p2), 64  }
   0xb   : > { %v2383_v0 = vld [vmem:[%s3658_s2] sm:$0xf]  ;;  %v2941_v1 = vld [vmem:[%s3658_s2] sm:$0x30]  ;;  %vm592_vm0 = vcmask 1045504   ;;  %s3672_s30 = smov (!%p468_p3, %s2347_s30), 1 }
   0xc   : > { %v2384_v2 = vor.u32 %v2941_v1, %v2383_v0  ;;  %v2421_v3 = vld [vmem:[%s3658_s2 + $0x18] sm:$0xf]  ;;  %v2948_v4 = vld [vmem:[%s3658_s2 + $0x18] sm:$0x30]  ;;  %v2374_v5 = vld [vmem:[%s3658_s2 + $0x8] sm:$0xf]  ;;  %s475_s15 = scalar_lea.vmem %s3657_s1, %s3672_s30 }
   0xd   : > { %v2422_v6 = vor.u32 %v2948_v4, %v2421_v3  ;;  %v2942_v7 = vld [vmem:[%s3658_s2 + $0x8] sm:$0x30]  ;;  %v2410_v10 = vld [vmem:[%s3658_s2 + $0x10] sm:$0xf]  ;;  %v2947_v11 = vld [vmem:[%s3658_s2 + $0x10] sm:$0x30] }
   0xe   : > { %v647_v8 = vsel %vm592_vm0, %v2384_v2, 0  ;;  %v2375_v9 = vor.u32 %v2942_v7, %v2374_v5  ;;  %s3037_s17 = smul.u32 44, %s3672_s30  ;;  %v2411_v13 = vor.u32 %v2947_v11, %v2410_v10  ;;  %vm576_vm1 = vcmask 97280  }
   0xf   : > { %656 = vmatpush.bf16.msra.mxu1 %v647_v8  ;;  %v862_v12 = vsel %vm592_vm0, %v2422_v6, 0  ;;  %vm831_vm2 = vcmask 1046528   ;;  %vm531_vm3 = vsmask.f32 7424  ;;  %vm481_vm4 = vcmask 523264  }
  0x10   : > { %871 = vmatpush.bf16.msra.mxu3 %v862_v12  ;;  %v594_v14 = vsel %vm592_vm0, %v2375_v9, 0  ;;  %s3189_s20 = scalar_lea.vmem %s3656_s0, %s3037_s17  ;;  %v780_v15 = vsel %vm592_vm0, %v2411_v13, 0  ;;  %vm966_vm5 = vcmask 124930   ;;  %vm970_vm6 = vcmask 126980  }
  0x11   : > { %603 = vmatpush.bf16.msra.mxu0 %v594_v14  ;;  %v2937_v16 = vld [vmem:[%s3189_s20] sm:$0xff]  ;;  %v3056_v18 = vld [vmem:[%s3189_s20 + $0x4] sm:$0xf0]  ;;  %v2943_v19 = vld [vmem:[%s3189_s20 + $0xc] sm:$0xff]  ;;  %789 = vmatpush.bf16.msra.mxu2 %v780_v15  ;;  %vm974_vm7 = vcmask 129030   ;;  %vm978_vm8 = vcmask 122880  }
  0x12   : > { %v683_v17 = vld [vmem:[%s3189_s20 + $0x4] sm:$0xff]   ;;  %v535_v22 = vshll.u32 %v2937_v16, 16  ;;  %2385 = vmatmul.msk.bf16.vlgmr.msra.gmra.mxu1 %vm576_vm1, %v2937_v16  ;;  %v533_v23 = vshrl.u32 %v2937_v16, 16  ;;  %v728_v25 = vshll.u32 %v2943_v19, 16  ;;  %v833_v27 = vrot.slane %v2943_v19, 1  ;;  %v2939_v39 = vld [vmem:[%s3189_s20 + $0x10] sm:$0xff] }
  0x13   : > { %v3057_v20 = vld [vmem:[%s3189_s20 + $0x4] sm:$0xe]  ;;  %v2938_v21 = vld [vmem:[%s3189_s20 + $0x8] sm:$0xff]  ;;  %v721_v30 = vshrl.u32 %v683_v17, 16  ;;  %v723_v31 = vshll.u32 %v683_v17, 16  ;;  %v2944_v41 = vld [vmem:[%s3189_s20 + $0x14] sm:$0xff] }
  0x14   : > { %v540_v24 = vshll.u32 %v2938_v21, 16  ;;  %v3058_v26 = vor.u32 %v3057_v20, %v3056_v18  ;;  %v537_v28 = vrot.slane %v535_v22, 1  ;;  %v730_v35 = vrot.slane %v728_v25, 1  ;;  %v2940_v54 = vld [vmem:[%s3189_s20 + $0x18] sm:$0xff]  ;;  %v499_v63 = vld [vmem:[%s3189_s20 + $0x20] sm:$0xf] }
  0x15   : > { %v725_v34 = vrot.slane %v723_v31, 1  ;;  %v544_v42 = vshrl.u32 %v2938_v21, 16  ;;  %v548_v43 = vshll.u32 %v2939_v39, 16  ;;  %v732_v44 = vshrl.u32 %v2943_v19, 16  ;;  %v2945_v55 = vld [vmem:[%s3189_s20 + $0x1c] sm:$0xff] }
  0x16   : > { %v542_v29 = vrot.slane %v540_v24, 1  ;;  %v832_v32 = vrot.slane %v3058_v26, 1  ;;  %v538_v33 = vor.u32 %v537_v28, %v533_v23  ;;  %v736_v45 = vshll.u32 %v2944_v41, 16  ;;  %v502_v0 = vld [vmem:[%s3189_s20 + $0x24] sm:$0x1] }
  0x17   : > { %v726_v38 = vor.u32 %v725_v34, %v721_v30  ;;  %v835_v46 = vrot.slane %v2944_v41, 1  ;;  %v550_v48 = vrot.slane %v548_v43, 1  ;;  %v734_v49 = vor.u32 %v732_v44, %v730_v35  ;;  %v2406_v8 = vld [vmem:[%s3189_s20 + $0x24] sm:$0xf]  ;;  %v2946_v9 = vld [vmem:[%s3189_s20 + $0x24] sm:$0x10] }
  0x18   : > { %v834_v36 = vsel %vm831_vm2, %v832_v32, %v833_v27  ;;  %v543_v37 = vsel %vm531_vm3, %v538_v33, %v542_v29  ;;  %v546_v47 = vor.u32 %v544_v42, %v542_v29  ;;  %v738_v50 = vrot.slane %v736_v45, 1 }
  0x19   : > { %2423 = vmatmul.msk.bf16.vlgmr.msra.gmra.mxu3 %vm576_vm1, %v834_v36  ;;  %2376 = vmatmul.msk.bf16.vlgmr.msra.gmra.mxu0 %vm576_vm1, %v543_v37  ;;  %v731_v40 = vsel %vm531_vm3, %v726_v38, %v730_v35  ;;  %v836_v51 = vsel %vm831_vm2, %v833_v27, %v835_v46  ;;  %v552_v56 = vshrl.u32 %v2939_v39, 16  ;;  %v556_v57 = vshll.u32 %v2940_v54, 16 }
  0x1a   : > { %2412 = vmatmul.msk.bf16.vlgmr.msra.gmra.mxu2 %vm576_vm1, %v731_v40  ;;  %v551_v52 = vsel %vm531_vm3, %v546_v47, %v550_v48  ;;  %v739_v53 = vsel %vm531_vm3, %v734_v49, %v738_v50  ;;  %v740_v58 = vshrl.u32 %v2944_v41, 16  ;;  %v744_v59 = vshll.u32 %v2945_v55, 16 }
  0x1b   : > { %v837_v60 = vrot.slane %v2945_v55, 1  ;;  %v554_v61 = vor.u32 %v552_v56, %v550_v48  ;;  %v558_v62 = vrot.slane %v556_v57, 1  ;;  %v524_v5 = vunpack.c.l.b16 %v499_v63 }
  0x1c   : > { %v742_v1 = vor.u32 %v740_v58, %v738_v50  ;;  %v746_v2 = vrot.slane %v744_v59, 1  ;;  %v525_v6 = vunpack.c.l.b16 %v502_v0  ;;  %v2407_v11 = vor.u32 %v2946_v9, %v2406_v8 }
  0x1d   : > { %v838_v3 = vsel %vm831_vm2, %v835_v46, %v837_v60  ;;  %v559_v4 = vsel %vm531_vm3, %v554_v61, %v558_v62  ;;  %v560_v12 = vshrl.u32 %v2940_v54, 16  ;;  %v748_v14 = vshrl.u32 %v2945_v55, 16 }
  0x1e   : > { %v747_v7 = vsel %vm531_vm3, %v742_v1, %v746_v2  ;;  %v530_v10 = vpack.c.b16 %v525_v6, %v524_v5  ;;  %v752_v15 = vshll.u32 %v2407_v11, 16  ;;  %v839_v16 = vrot.slane %v2407_v11, 1 }
  0x1f   : > { %v562_v17 = vor.u32 %v560_v12, %v558_v62  ;;  %v750_v19 = vor.u32 %v748_v14, %v746_v2  ;;  %v629_v24 = vpack.c.b16 %v524_v5, %v524_v5  ;;  %v756_v26 = vshrl.u32 %v2407_v11, 16 }
  0x20   : > { %v564_v13 = vshll.u32 %v530_v10, 16  ;;  %v754_v20 = vrot.slane %v752_v15, 1  ;;  %v568_v25 = vshrl.u32 %v530_v10, 16  ;;  %v3067_v30 = vmov 0.0  }
  0x21   : > { %482 = vst.msk [vmem:[#allocation2] sm:$0xff] %vm481_vm4, %v3067_v30  ;;  %vm946_vm9 = vcmask 386305   ;;  %vm950_vm10 = vcmask 388355   ;;  %vm954_vm11 = vcmask 390405   ;;  %vm958_vm12 = vcmask 392455  }
  0x22   : > { %2386 = vmatmul.msk.bf16.gmra.mxu1 %vm576_vm1, %v2938_v21  ;;  %v566_v18 = vrot.slane %v564_v13, 1  ;;  %v840_v21 = vsel %vm831_vm2, %v837_v60, %v839_v16  ;;  %v755_v23 = vsel %vm531_vm3, %v750_v19, %v754_v20  ;;  %v758_v28 = vor.u32 %v756_v26, %v754_v20  ;;  %483 = vst.msk [vmem:[#allocation2 + $0x8] sm:$0xff] %vm481_vm4, %v3067_v30 }
  0x23   : > { %484 = vst.msk [vmem:[#allocation2 + $0x10] sm:$0xff] %vm481_vm4, %v3067_v30  ;;  %vm941_vm13 = vcmask 516480   ;;  %vm948_vm14 = vcmask 518530   ;;  %vm952_vm15 = vcmask 520580   ;;  %vm956_vm0 = vcmask 522630  }
  0x24   : > { %v567_v22 = vsel %vm531_vm3, %v562_v17, %v566_v18  ;;  %v570_v27 = vor.u32 %v568_v25, %v566_v18  ;;  %485 = vst.msk [vmem:[#allocation2 + $0x18] sm:$0xff] %vm481_vm4, %v3067_v30  ;;  %vm972_vm2 = vcmask 259205   ;;  %vm976_vm3 = vcmask 261255  }
  0x25   : > { %486 = vst [vmem:[#allocation3] sm:$0xff] %v3067_v30 }
  0x26   : > { %487 = vst [vmem:[#allocation3 + $0x8] sm:$0xff] %v3067_v30 }
  0x27   : > { %488 = vst.msk [vmem:[#allocation4] sm:$0xff] %vm481_vm4, %v3067_v30 }
  0x28   : > { %489 = vst.msk [vmem:[#allocation4 + $0x8] sm:$0xff] %vm481_vm4, %v3067_v30 }
  0x29   : > { %2424 = vmatmul.msk.bf16.gmra.mxu3 %vm576_vm1, %v836_v51  ;;  %2377 = vmatmul.msk.bf16.gmra.mxu0 %vm576_vm1, %v551_v52  ;;  %490 = vst.msk [vmem:[#allocation4 + $0x10] sm:$0xff] %vm481_vm4, %v3067_v30 }
  0x2a   : > { %2413 = vmatmul.msk.bf16.gmra.mxu2 %vm576_vm1, %v739_v53 }
  0x32   : > { %2387 = vmatmul.msk.bf16.gmra.mxu1 %vm576_vm1, %v2939_v39  ;;  %v3248_v39 = vld [vmem:[%s3659_s3] ss:$0 sm:$0xff] }
  0x39   : > { %2425 = vmatmul.msk.bf16.gmra.mxu3 %vm576_vm1, %v838_v3  ;;  %2378 = vmatmul.msk.bf16.gmra.mxu0 %vm576_vm1, %v559_v4 }
  0x3a   : > { %2414 = vmatmul.msk.bf16.gmra.mxu2 %vm576_vm1, %v747_v7 }
  0x42   : > { %2388 = vmatmul.msk.bf16.gmra.mxu1 %vm576_vm1, %v2940_v54 }
  0x49   : > { %2426 = vmatmul.msk.bf16.gmra.mxu3 %vm576_vm1, %v840_v21  ;;  %2379 = vmatmul.msk.bf16.gmra.mxu0 %vm576_vm1, %v567_v22 }
  0x4a   : > { %2415 = vmatmul.msk.bf16.gmra.mxu2 %vm576_vm1, %v755_v23 }
  0x52   : > { %2389 = vmatmul.msk.bf16.gmra.mxu1 %vm576_vm1, %v629_v24 }
  0x59   : > { %2427 = vmatmul.msk.bf16.gmra.mxu3 %vm576_vm1, %v839_v16  ;;  %2380 = vmatmul.msk.bf16.gmra.mxu0 %vm576_vm1, %v570_v27 }
  0x5a   : > { %2416 = vmatmul.msk.bf16.gmra.mxu2 %vm576_vm1, %v758_v28  ;;  %vm968_vm1 = vcmask 257155  }
  0x8f   : > { %v658_v29 = vpop.f32.mrf.mxu1 }
  0x96   : > { %v605_v31 = vpop.f32.mrf.mxu0 }
  0x97   : > { %v660_v32 = vpop.f32.mrf.mxu1  ;;  %v659_v33 = vadd.f32 %v658_v29, %v605_v31 }
  0x9c   : > { %v873_v34 = vpop.f32.mrf.mxu3 }
  0x9d   : > { %v791_v36 = vpop.f32.mrf.mxu2 }
  0x9e   : > { %v607_v35 = vpop.f32.mrf.mxu0  ;;  %v815_v38 = vadd.f32 %v791_v36, %v659_v33 }
  0x9f   : > { %v663_v37 = vpop.f32.mrf.mxu1  ;;  %v661_v43 = vadd.f32 %v660_v32, %v607_v35 }
  0xa0   : > { %v897_v40 = vadd.f32 %v873_v34, %v815_v38 }
  0xa2   : > { %v910_v42 = vadd.f32 %v3248_v39, %v897_v40 }
  0xa4   : > { %v875_v41 = vpop.f32.mrf.mxu3  ;;  %v919_v45 = vmul.f32 0.2, %v910_v42 }
  0xa5   : > { %v793_v46 = vpop.f32.mrf.mxu2 }
  0xa6   : > { %v610_v44 = vpop.f32.mrf.mxu0  ;;  %v816_v48 = vadd.f32 %v793_v46, %v661_v43  ;;  %v928_v49 = vmax.f32 %v910_v42, %v919_v45 }
  0xa7   : > { %v665_v47 = vpop.f32.mrf.mxu1  ;;  %v664_v51 = vadd.f32 %v663_v37, %v610_v44 }
  0xa8   : > { %v898_v50 = vadd.f32 %v875_v41, %v816_v48  ;;  %938 = vrot.lane.b32.xlu0 %v928_v49, %s3068_s23  ;;  %943 = vrot.lane.b32.xlu2 %v928_v49, %s3069_s24 }
  0xaa   : > { %v911_v52 = vadd.f32 %v3248_v39, %v898_v50 }
  0xac   : > { %v878_v53 = vpop.f32.mrf.mxu3  ;;  %v920_v54 = vmul.f32 0.2, %v911_v52 }
  0xad   : > { %v796_v56 = vpop.f32.mrf.mxu2 }
  0xae   : > { %v612_v55 = vpop.f32.mrf.mxu0  ;;  %v929_v58 = vmax.f32 %v911_v52, %v920_v54  ;;  %v817_v59 = vadd.f32 %v796_v56, %v664_v51 }
  0xaf   : > { %v668_v57 = vpop.f32.mrf.mxu1  ;;  %v666_v63 = vadd.f32 %v665_v47, %v612_v55 }
  0xb0   : > { %v899_v60 = vadd.f32 %v878_v53, %v817_v59  ;;  %961 = vrot.lane.b32.xlu0 %v929_v58, %s3070_s25  ;;  %967 = vst.msk [vmem:[#allocation2 + $0x4] sm:$0x4] %vm966_vm5, %v929_v58 }
  0xb1   : > { %971 = vst.msk [vmem:[#allocation2 + $0x3] sm:$0x10] %vm970_vm6, %v929_v58 }
  0xb2   : > { %v912_v61 = vadd.f32 %v3248_v39, %v899_v60  ;;  %975 = vst.msk [vmem:[#allocation2 + $0x2] sm:$0x40] %vm974_vm7, %v929_v58 }
  0xb4   : > { %v880_v62 = vpop.f32.mrf.mxu3  ;;  %v921_v1 = vmul.f32 0.2, %v912_v61 }
  0xb5   : > { %v798_v2 = vpop.f32.mrf.mxu2 }
  0xb6   : > { %v615_v0 = vpop.f32.mrf.mxu0  ;;  %v818_v4 = vadd.f32 %v798_v2, %v666_v63  ;;  %v930_v5 = vmax.f32 %v912_v61, %v921_v1  ;;  %v2951_v1 = vld [vmem:[%s3660_s4 + $0x10] sm:$0xff]  ;;  %v2960_v2 = vld [vmem:[%s3660_s4 + $0x58] sm:$0xff] }
  0xb7   : > { %v670_v3 = vpop.f32.mrf.mxu1  ;;  %v669_v7 = vadd.f32 %v668_v57, %v615_v0  ;;  %v2955_v0 = vld [vmem:[%s3660_s4 + $0x30] sm:$0xff]  ;;  %1260 = vmatpush.bf16.msrb.mxu2 %v2960_v2 }
  0xb8   : > { %v900_v6 = vadd.f32 %v880_v62, %v818_v4  ;;  %981 = vrot.lane.b32.xlu1 %v930_v5, %s3068_s23  ;;  %985 = vrot.lane.b32.xlu2 %v930_v5, %s3069_s24  ;;  %979 = vst.msk [vmem:[#allocation2 + $0x9] sm:$0x1] %vm978_vm8, %v930_v5  ;;  %v2952_v62 = vld [vmem:[%s3660_s4 + $0x18] sm:$0xff] }
  0xb9   : > { %1198 = vmatpush.bf16.msrb.mxu1 %v2952_v62 }
  0xba   : > { %v913_v8 = vadd.f32 %v3248_v39, %v900_v6  ;;  %v2954_v6 = vld [vmem:[%s3660_s4 + $0x28] sm:$0xff] }
  0xbc   : > { %v883_v9 = vpop.f32.mrf.mxu3  ;;  %v922_v10 = vmul.f32 0.2, %v913_v8 }
  0xbd   : > { %v801_v12 = vpop.f32.mrf.mxu2  ;;  %1199 = vmatpush.bf16.msrb.mxu1 %v2951_v1 }
  0xbe   : > { %v617_v11 = vpop.f32.mrf.mxu0  ;;  %v931_v14 = vmax.f32 %v913_v8, %v922_v10  ;;  %v819_v15 = vadd.f32 %v801_v12, %v669_v7  ;;  %v2950_v7 = vld [vmem:[%s3660_s4 + $0x8] sm:$0xff]  ;;  %v2959_v10 = vld [vmem:[%s3660_s4 + $0x50] sm:$0xff] }
  0xbf   : > { %v673_v13 = vpop.f32.mrf.mxu1  ;;  %v671_v19 = vadd.f32 %v670_v3, %v617_v11  ;;  %v2964_v3 = vld [vmem:[%s3660_s4 + $0x78] sm:$0xff]  ;;  %v2963_v11 = vld [vmem:[%s3660_s4 + $0x70] sm:$0xff]  ;;  %1261 = vmatpush.bf16.msrb.mxu2 %v2959_v10 }
  0xc0   : > { %v901_v16 = vadd.f32 %v883_v9, %v819_v15  ;;  %994 = vrot.lane.b32.xlu2 %v931_v14, %s3068_s23  ;;  %1002 = vrot.lane.b32.xlu0 %v931_v14, %s3070_s25  ;;  %1006 = vst.msk [vmem:[#allocation2 + $0x7] sm:$0x10] %vm970_vm6, %v931_v14 }
  0xc1   : > { %1008 = vst.msk [vmem:[#allocation2 + $0x6] sm:$0x40] %vm974_vm7, %v931_v14  ;;  %1325 = vmatpush.bf16.msrb.mxu3 %v2964_v3  ;;  %1200 = vmatpush.bf16.msrb.mxu1 %v2950_v7 }
  0xc2   : > { %v914_v17 = vadd.f32 %v3248_v39, %v901_v16  ;;  %v2949_v16 = vld [vmem:[%s3660_s4] sm:$0xff] }
  0xc4   : > { %v885_v18 = vpop.f32.mrf.mxu3  ;;  %v923_v20 = vmul.f32 0.2, %v914_v17 }
  0xc5   : > { %v803_v22 = vpop.f32.mrf.mxu2  ;;  %1326 = vmatpush.bf16.msrb.mxu3 %v2963_v11  ;;  %1201 = vmatpush.bf16.msrb.mxu1 %v2949_v16 }
  0xc6   : > { %v620_v21 = vpop.f32.mrf.mxu0  ;;  %v932_v24 = vmax.f32 %v914_v17, %v923_v20  ;;  %v820_v25 = vadd.f32 %v803_v22, %v671_v19  ;;  %v2958_v17 = vld [vmem:[%s3660_s4 + $0x48] sm:$0xff] }
  0xc7   : > { %v675_v23 = vpop.f32.mrf.mxu1  ;;  %v674_v28 = vadd.f32 %v673_v13, %v620_v21  ;;  %v2953_v13 = vld [vmem:[%s3660_s4 + $0x20] sm:$0xff]  ;;  %1262 = vmatpush.bf16.msrb.mxu2 %v2958_v17 }
  0xc8   : > { %v902_v26 = vadd.f32 %v885_v18, %v820_v25  ;;  %998 = vrot.lane.b32.xlu0 %v931_v14, %s3069_s24  ;;  %1012 = vrot.lane.b32.xlu1 %v932_v24, %s3070_s25  ;;  %1016 = vst.msk [vmem:[#allocation2 + $0xc] sm:$0x4] %vm966_vm5, %v932_v24  ;;  %v2962_v18 = vld [vmem:[%s3660_s4 + $0x68] sm:$0xff]  ;;  %v1355_v17 = vld [vmem:[%s3663_s7] sm:$0x1] }
  0xc9   : > { %1010 = vst.msk [vmem:[#allocation2 + $0xd] sm:$0x1] %vm978_vm8, %v932_v24  ;;  %1327 = vmatpush.bf16.msrb.mxu3 %v2962_v18  ;;  %v2966_v25 = vld [vmem:[%s3662_s6 + $0x8] sm:$0xff] }
  0xca   : > { %v915_v27 = vadd.f32 %v3248_v39, %v902_v26  ;;  %v2968_v26 = vld [vmem:[%s3664_s8 + $0x8] sm:$0xff] }
  0xcb   : > { %1408 = vmatpush.bf16.msra.mxu1 %v2968_v26 }
  0xcc   : > { %v888_v29 = vpop.f32.mrf.mxu3  ;;  %v924_v30 = vmul.f32 0.2, %v915_v27 }
  0xcd   : > { %v806_v32 = vpop.f32.mrf.mxu2 }
  0xce   : > { %v622_v31 = vpop.f32.mrf.mxu0  ;;  %v933_v34 = vmax.f32 %v915_v27, %v924_v30  ;;  %v821_v35 = vadd.f32 %v806_v32, %v674_v28  ;;  %v2957_v27 = vld [vmem:[%s3660_s4 + $0x40] sm:$0xff] }
  0xcf   : > { %v678_v33 = vpop.f32.mrf.mxu1  ;;  %v676_v38 = vadd.f32 %v675_v23, %v622_v31  ;;  %v2961_v28 = vld [vmem:[%s3660_s4 + $0x60] sm:$0xff]  ;;  %1263 = vmatpush.bf16.msrb.mxu2 %v2957_v27 }
  0xd0   : > { %v903_v36 = vadd.f32 %v888_v29, %v821_v35  ;;  %1021 = vrot.lane.b32.xlu0 %v932_v24, %s3069_s24  ;;  %1017 = vrot.lane.b32.xlu1 %v932_v24, %s3068_s23  ;;  %1042 = vst.msk [vmem:[#allocation2 + $0xa] sm:$0x40] %vm974_vm7, %v933_v34  ;;  %v2967_v35 = vld [vmem:[%s3664_s8] sm:$0xff] }
  0xd1   : > { %1328 = vmatpush.bf16.msrb.mxu3 %v2961_v28  ;;  %1409 = vmatpush.bf16.msra.mxu1 %v2967_v35 }
  0xd2   : > { %v916_v37 = vadd.f32 %v3248_v39, %v903_v36 }
  0xd4   : > { %v890_v40 = vpop.f32.mrf.mxu3  ;;  %v925_v41 = vmul.f32 0.2, %v916_v37 }
  0xd5   : > { %v808_v43 = vpop.f32.mrf.mxu2 }
  0xd6   : > { %v625_v42 = vpop.f32.mrf.mxu0  ;;  %v934_v45 = vmax.f32 %v916_v37, %v925_v41  ;;  %v822_v46 = vadd.f32 %v808_v43, %v676_v38 }
  0xd7   : > { %v680_v44 = vpop.f32.mrf.mxu1  ;;  %v679_v49 = vadd.f32 %v678_v33, %v625_v42 }
  0xd8   : > { %v904_v47 = vadd.f32 %v890_v40, %v822_v46  ;;  %1038 = vrot.lane.b32.xlu1 %v933_v34, %s3070_s25  ;;  %1053 = vrot.lane.b32.xlu0 %v934_v45, %s3068_s23  ;;  %1050 = vst.msk [vmem:[#allocation2 + $0x10] sm:$0x4] %vm966_vm5, %v934_v45 }
  0xd9   : > { %1057 = vrot.lane.b32.xlu2 %v934_v45, %s3069_s24  ;;  %1052 = vst.msk [vmem:[#allocation2 + $0xf] sm:$0x10] %vm970_vm6, %v934_v45 }
  0xda   : > { %v917_v48 = vadd.f32 %v3248_v39, %v904_v47  ;;  %1044 = vst.msk [vmem:[#allocation2 + $0x11] sm:$0x1] %vm978_vm8, %v934_v45 }
  0xdc   : > { %v893_v50 = vpop.f32.mrf.mxu3  ;;  %v926_v51 = vmul.f32 0.2, %v917_v48 }
  0xdd   : > { %v811_v53 = vpop.f32.mrf.mxu2 }
  0xde   : > { %v627_v52 = vpop.f32.mrf.mxu0  ;;  %v935_v54 = vmax.f32 %v917_v48, %v926_v51  ;;  %v823_v55 = vadd.f32 %v811_v53, %v679_v49 }
  0xe0   : > { %1032 = vrot.lane.b32.xlu1 %v933_v34, %s3069_s24  ;;  %1066 = vrot.lane.b32.xlu0 %v935_v54, %s3069_s24  ;;  %v905_v56 = vadd.f32 %v893_v50, %v823_v55 }
  0xe1   : > { %1028 = vrot.lane.b32.xlu2 %v933_v34, %s3068_s23  ;;  %v2965_v34 = vld [vmem:[%s3662_s6] sm:$0xff] }
  0xe2   : > { %v918_v57 = vadd.f32 %v3248_v39, %v905_v56  ;;  %v2956_v39 = vld [vmem:[%s3660_s4 + $0x38] sm:$0xff] }
  0xe3   : > { %1150 = vmatpush.bf16.msrb.mxu0 %v2956_v39 }
  0xe4   : > { %v895_v58 = vpop.f32.mrf.mxu3  ;;  %v927_v59 = vmul.f32 0.2, %v918_v57 }
  0xe5   : > { %v813_v60 = vpop.f32.mrf.mxu2 }
  0xe6   : > { %v936_v61 = vmax.f32 %v918_v57, %v927_v59  ;;  %v1349_v57 = vld [vmem:[%s475_s15] sm:$0x1] }
  0xe7   : > { %1151 = vmatpush.bf16.msrb.mxu0 %v2955_v0  ;;  %v1350_v60 = vpack.c.bf16 %v1349_v57, %v1349_v57  ;;  %v2982_v57 = vld [vmem:[%s3666_s10 + $0x68] sm:$0xff] }
  0xe8   : > { %1062 = vrot.lane.b32.xlu1 %v935_v54, %s3068_s23  ;;  %1088 = vst.msk [vmem:[#allocation2 + $0x12] sm:$0x40] %vm974_vm7, %v936_v61  ;;  %vm1480_vm7 = vcmask 256002   ;;  %s3072_s23 = smov 96  }
  0xe9   : > { %1046 = vrot.lane.b32.xlu2 %v934_v45, %s3070_s25  ;;  %1084 = vst.msk [vmem:[#allocation2 + $0x14] sm:$0x4] %vm966_vm5, %v936_v61  ;;  %vm964_vm5 = vcmask 255105  }
  0xea   : > { %1086 = vst.msk [vmem:[#allocation2 + $0x13] sm:$0x10] %vm970_vm6, %v936_v61  ;;  %vm1368_vm6 = vcmask 261120  }
  0xeb   : > { %1078 = vst.msk [vmem:[#allocation2 + $0x15] sm:$0x1] %vm978_vm8, %v936_v61  ;;  %1152 = vmatpush.bf16.msrb.mxu0 %v2954_v6  ;;  %vm1454_vm8 = vcmask 253952  }
  0xef   : > { %1153 = vmatpush.bf16.msrb.mxu0 %v2953_v13 }
  0xf0   : > { %1074 = vrot.lane.b32.xlu1 %v935_v54, %s3070_s25 }
  0xf1   : > { %1080 = vrot.lane.b32.xlu2 %v936_v61, %s3070_s25 }
  0xf3   : > { %1378 = vmatpush.bf16.msra.mxu0 %v2966_v25 }
  0xf7   : > { %1379 = vmatpush.bf16.msra.mxu0 %v2965_v34 }
 0x102   : > { %v944_v63 = vpop.permute.xlu2 %943 }
 0x103   : > { %947 = vst.msk [vmem:[#allocation2] sm:$0x2] %vm946_vm9, %v944_v63 }
 0x104   : > { %951 = vst.msk [vmem:[#allocation2 - $0x1] sm:$0x8] %vm950_vm10, %v944_v63 }
 0x105   : > { %955 = vst.msk [vmem:[#allocation2 - $0x2] sm:$0x20] %vm954_vm11, %v944_v63 }
 0x106   : > { %959 = vst.msk [vmem:[#allocation2 - $0x3] sm:$0x80] %vm958_vm12, %v944_v63 }
 0x112   : > { %v986_v5 = vpop.permute.xlu2 %985 }
 0x11a   : > { %v939_v4 = vpop.permute.xlu0 %938  ;;  %v995_v9 = vpop.permute.xlu2 %994 }
 0x11b   : > { %942 = vst.msk [vmem:[#allocation2] sm:$0x1] %vm941_vm13, %v939_v4 }
 0x11c   : > { %949 = vst.msk [vmem:[#allocation2 - $0x1] sm:$0x4] %vm948_vm14, %v939_v4 }
 0x11d   : > { %953 = vst.msk [vmem:[#allocation2 - $0x2] sm:$0x10] %vm952_vm15, %v939_v4 }
 0x11e   : > { %957 = vst.msk [vmem:[#allocation2 - $0x3] sm:$0x40] %vm956_vm0, %v939_v4 }
 0x122   : > { %v962_v8 = vpop.permute.xlu0 %961 }
 0x123   : > { %969 = vst.msk [vmem:[#allocation2 + $0x3] sm:$0x8] %vm968_vm1, %v962_v8 }
 0x124   : > { %973 = vst.msk [vmem:[#allocation2 + $0x2] sm:$0x20] %vm972_vm2, %v962_v8 }
 0x125   : > { %977 = vst.msk [vmem:[#allocation2 + $0x1] sm:$0x80] %vm976_vm3, %v962_v8 }
 0x126   : > { %992 = vst.msk [vmem:[#allocation2 + $0x1] sm:$0x80] %vm958_vm12, %v986_v5 }
 0x127   : > { %997 = vst.msk [vmem:[#allocation2 + $0x8] sm:$0x1] %vm941_vm13, %v995_v9 }
 0x128   : > { %988 = vst.msk [vmem:[#allocation2 + $0x3] sm:$0x8] %vm950_vm10, %v986_v5 }
 0x129   : > { %990 = vst.msk [vmem:[#allocation2 + $0x2] sm:$0x20] %vm954_vm11, %v986_v5 }
 0x12a   : > { %965 = vst.msk [vmem:[#allocation2 + $0x4] sm:$0x2] %vm964_vm5, %v962_v8  ;;  %v982_v12 = vpop.permute.xlu1 %981 }
 0x12b   : > { %984 = vst.msk [vmem:[#allocation2 + $0x3] sm:$0x4] %vm948_vm14, %v982_v12 }
 0x12c   : > { %989 = vst.msk [vmem:[#allocation2 + $0x2] sm:$0x10] %vm952_vm15, %v982_v12 }
 0x12d   : > { %991 = vst.msk [vmem:[#allocation2 + $0x1] sm:$0x40] %vm956_vm0, %v982_v12 }
 0x132   : > { %v1003_v14 = vpop.permute.xlu0 %1002 }
 0x133   : > { %1005 = vst.msk [vmem:[#allocation2 + $0x7] sm:$0x8] %vm968_vm1, %v1003_v14  ;;  %v1058_v15 = vpop.permute.xlu2 %1057 }
 0x134   : > { %1007 = vst.msk [vmem:[#allocation2 + $0x6] sm:$0x20] %vm972_vm2, %v1003_v14  ;;  %v1089_v37 = vld [vmem:[#allocation2] sm:$0xff] }
 0x135   : > { %1009 = vst.msk [vmem:[#allocation2 + $0x5] sm:$0x80] %vm976_vm3, %v1003_v14  ;;  %v1102_v42 = vld [vmem:[#allocation2 + $0x1] sm:$0xff]  ;;  %v1389_v14 = vld [vmem:[%s3665_s9] sm:$0x1] }
 0x13a   : > { %v999_v19 = vpop.permute.xlu0 %998  ;;  %v1013_v20 = vpop.permute.xlu1 %1012 }
 0x13b   : > { %1001 = vst.msk [vmem:[#allocation2 + $0x8] sm:$0x2] %vm946_vm9, %v999_v19  ;;  %v1029_v21 = vpop.permute.xlu2 %1028 }
 0x13c   : > { %1015 = vst.msk [vmem:[#allocation2 + $0xc] sm:$0x2] %vm964_vm5, %v1013_v20  ;;  %v3053_v20 = vld [vmem:[%s3661_s5] ss:$0 sm:$0xff] }
 0x142   : > { %v1022_v22 = vpop.permute.xlu0 %1021  ;;  %v1018_v23 = vpop.permute.xlu1 %1017 }
 0x143   : > { %1024 = vst.msk [vmem:[#allocation2 + $0x6] sm:$0x20] %vm954_vm11, %v1022_v22  ;;  %v1047_v24 = vpop.permute.xlu2 %1046 }
 0x144   : > { %1026 = vst.msk [vmem:[#allocation2 + $0x5] sm:$0x80] %vm958_vm12, %v1022_v22 }
 0x145   : > { %1031 = vst.msk [vmem:[#allocation2 + $0xc] sm:$0x1] %vm941_vm13, %v1029_v21 }
 0x146   : > { %1020 = vst.msk [vmem:[#allocation2 + $0x6] sm:$0x10] %vm952_vm15, %v1018_v23 }
 0x147   : > { %1025 = vst.msk [vmem:[#allocation2 + $0x5] sm:$0x40] %vm956_vm0, %v1018_v23 }
 0x148   : > { %1049 = vst.msk [vmem:[#allocation2 + $0x10] sm:$0x2] %vm964_vm5, %v1047_v24 }
 0x149   : > { %1051 = vst.msk [vmem:[#allocation2 + $0xf] sm:$0x8] %vm968_vm1, %v1047_v24 }
 0x14a   : > { %v1039_v29 = vpop.permute.xlu1 %1038  ;;  %v1054_v30 = vpop.permute.xlu0 %1053 }
 0x14b   : > { %1041 = vst.msk [vmem:[#allocation2 + $0xa] sm:$0x20] %vm972_vm2, %v1039_v29  ;;  %v1081_v31 = vpop.permute.xlu2 %1080 }
 0x14c   : > { %1043 = vst.msk [vmem:[#allocation2 + $0x9] sm:$0x80] %vm976_vm3, %v1039_v29 }
 0x14d   : > { %1060 = vst.msk [vmem:[#allocation2 + $0x9] sm:$0x80] %vm958_vm12, %v1058_v15  ;;  %vm1439_vm12 = vcmask 779777  }
 0x14e   : > { %1056 = vst.msk [vmem:[#allocation2 + $0x9] sm:$0x40] %vm956_vm0, %v1054_v30  ;;  %v1212_v45 = vld [vmem:[#allocation2 + $0x5] sm:$0xff]  ;;  %vm1465_vm0 = vcmask 1045252  }
 0x14f   : > { %1083 = vst.msk [vmem:[#allocation2 + $0x14] sm:$0x2] %vm964_vm5, %v1081_v31  ;;  %vm1812_vm5 = vcmask 520195  }
 0x150   : > { %1085 = vst.msk [vmem:[#allocation2 + $0x13] sm:$0x8] %vm968_vm1, %v1081_v31  ;;  %vm1434_vm1 = vcmask 1041152  }
 0x151   : > { %1087 = vst.msk [vmem:[#allocation2 + $0x12] sm:$0x20] %vm972_vm2, %v1081_v31  ;;  %vm1478_vm2 = vcmask 517377  }
 0x152   : > { %v1033_v32 = vpop.permute.xlu1 %1032  ;;  %v1067_v33 = vpop.permute.xlu0 %1066 }
 0x153   : > { %1035 = vst.msk [vmem:[#allocation2 + $0xc] sm:$0x2] %vm946_vm9, %v1033_v32 }
 0x154   : > { %1036 = vst.msk [vmem:[#allocation2 + $0xb] sm:$0x4] %vm948_vm14, %v1029_v21 }
 0x155   : > { %1037 = vst.msk [vmem:[#allocation2 + $0xb] sm:$0x8] %vm950_vm10, %v1033_v32 }
 0x156   : > { %1069 = vst.msk [vmem:[#allocation2 + $0x10] sm:$0x2] %vm946_vm9, %v1067_v33  ;;  %vm1450_vm9 = vcmask 260102  }
 0x157   : > { %1071 = vst.msk [vmem:[#allocation2 + $0xf] sm:$0x8] %vm950_vm10, %v1067_v33  ;;  %vm1467_vm10 = vcmask 783877  }
 0x158   : > { %1073 = vst.msk [vmem:[#allocation2 + $0xe] sm:$0x20] %vm954_vm11, %v1067_v33  ;;  %v1214_v55 = vld [vmem:[#allocation2 + $0x15] sm:$0xf]  ;;  %vm1452_vm11 = vcmask 523527  }
 0x159   : > { %v1279_v56 = vld [vmem:[#allocation2 + $0x16] sm:$0xf]  ;;  %v1216_v58 = vpack.c.bf16 %v1214_v55, %v1214_v55 }
 0x15a   : > { %v1063_v36 = vpop.permute.xlu1 %1062  ;;  %v1281_v59 = vpack.c.bf16 %v1279_v56, %v1279_v56  ;;  %v2991_v55 = vld [vmem:[%s3666_s10 + $0xb0] sm:$0xff] }
 0x15b   : > { %1065 = vst.msk [vmem:[#allocation2 + $0x10] sm:$0x1] %vm941_vm13, %v1063_v36  ;;  %v1277_v46 = vld [vmem:[#allocation2 + $0x6] sm:$0xff]  ;;  %v2999_v56 = vld [vmem:[%s3666_s10 + $0xf0] sm:$0xff]  ;;  %vm1443_vm13 = vcmask 781827  }
 0x15c   : > { %1070 = vst.msk [vmem:[#allocation2 + $0xf] sm:$0x4] %vm948_vm14, %v1063_v36  ;;  %v1090_v38 = vld [vmem:[#allocation2 + $0x8] sm:$0xff]  ;;  %vm1448_vm14 = vcmask 521477  }
 0x15d   : > { %1072 = vst.msk [vmem:[#allocation2 + $0xe] sm:$0x10] %vm952_vm15, %v1063_v36  ;;  %v1092_v40 = vpack.c.bf16 %v1090_v38, %v1089_v37  ;;  %vm1441_vm15 = vcmask 1043202  }
 0x15f   : > { %2470 = vmatmul.msk.bf16.vlgmr.msrb.gmra.mxu1 %vm481_vm4, %v1092_v40 }
 0x162   : > { %v1075_v41 = vpop.permute.xlu1 %1074  ;;  %v1103_v43 = vld [vmem:[#allocation2 + $0x9] sm:$0xff] }
 0x163   : > { %1077 = vst.msk [vmem:[#allocation2 + $0xd] sm:$0x80] %vm976_vm3, %v1075_v41  ;;  %v1105_v44 = vpack.c.bf16 %v1103_v43, %v1102_v42  ;;  %vm1810_vm3 = vcmask 517120  }
 0x164   : > { %v1091_v49 = vld [vmem:[#allocation2 + $0x10] sm:$0xf] }
 0x165   : > { %2452 = vmatmul.msk.bf16.vlgmr.msrb.gmra.mxu0 %vm481_vm4, %v1105_v44  ;;  %v1093_v52 = vpack.c.bf16 %v1091_v49, %v1091_v49  ;;  %v2984_v49 = vld [vmem:[%s3666_s10 + $0x78] sm:$0xff] }
 0x166   : > { %1567 = vmatpush.bf16.msra.mxu2 %v2984_v49  ;;  %v3016_v49 = vld [vmem:[%s3668_s12 + $0x78] sm:$0xff] }
 0x16a   : > { %v1213_v47 = vld [vmem:[#allocation2 + $0xd] sm:$0xff] }
 0x16b   : > { %v1278_v48 = vld [vmem:[#allocation2 + $0xe] sm:$0xff]  ;;  %v1215_v50 = vpack.c.bf16 %v1213_v47, %v1212_v45 }
 0x16c   : > { %v1280_v51 = vpack.c.bf16 %v1278_v48, %v1277_v46  ;;  %v1104_v53 = vld [vmem:[#allocation2 + $0x11] sm:$0xf] }
 0x16d   : > { %2496 = vmatmul.msk.bf16.vlgmr.msrb.gmra.mxu2 %vm481_vm4, %v1215_v50  ;;  %v1106_v54 = vpack.c.bf16 %v1104_v53, %v1104_v53  ;;  %v2976_v50 = vld [vmem:[%s3666_s10 + $0x38] sm:$0xff] }
 0x16e   : > { %2522 = vmatmul.msk.bf16.vlgmr.msrb.gmra.mxu3 %vm481_vm4, %v1280_v51  ;;  %v2983_v51 = vld [vmem:[%s3666_s10 + $0x70] sm:$0xff]  ;;  %v2992_v53 = vld [vmem:[%s3666_s10 + $0xb8] sm:$0xff] }
 0x16f   : > { %2471 = vmatmul.msk.bf16.gmra.mxu1 %vm481_vm4, %v1093_v52  ;;  %1628 = vmatpush.bf16.msra.mxu3 %v2976_v50  ;;  %v2975_v52 = vld [vmem:[%s3666_s10 + $0x30] sm:$0xff]  ;;  %v3036_v50 = vld [vmem:[%s3668_s12 + $0x118] sm:$0xff] }
 0x170   : > { %1708 = vmatpush.bf16.msrb.mxu0 %v2992_v53  ;;  %1568 = vmatpush.bf16.msra.mxu2 %v2983_v51  ;;  %v3011_v51 = vld [vmem:[%s3668_s12 + $0x50] sm:$0xff] }
 0x171   : > { %v3035_v53 = vld [vmem:[%s3668_s12 + $0x110] sm:$0xff] }
 0x173   : > { %1629 = vmatpush.bf16.msra.mxu3 %v2975_v52  ;;  %v3015_v52 = vld [vmem:[%s3668_s12 + $0x70] sm:$0xff] }
 0x174   : > { %1709 = vmatpush.bf16.msrb.mxu0 %v2991_v55  ;;  %1569 = vmatpush.bf16.msra.mxu2 %v2982_v57  ;;  %v3014_v55 = vld [vmem:[%s3668_s12 + $0x68] sm:$0xff] }
 0x175   : > { %2453 = vmatmul.msk.bf16.gmra.mxu0 %vm481_vm4, %v1106_v54  ;;  %v3000_v54 = vld [vmem:[%s3666_s10 + $0xf8] sm:$0xff] }
 0x176   : > { %1789 = vmatpush.bf16.msrb.mxu1 %v3000_v54  ;;  %v3010_v54 = vld [vmem:[%s3668_s12 + $0x48] sm:$0xff] }
 0x17a   : > { %1790 = vmatpush.bf16.msrb.mxu1 %v2999_v56  ;;  %v3034_v56 = vld [vmem:[%s3668_s12 + $0x108] sm:$0xff] }
 0x17d   : > { %2497 = vmatmul.msk.bf16.gmra.mxu2 %vm481_vm4, %v1216_v58  ;;  %v2974_v58 = vld [vmem:[%s3666_s10 + $0x28] sm:$0xff] }
 0x17e   : > { %2523 = vmatmul.msk.bf16.gmra.mxu3 %vm481_vm4, %v1281_v59  ;;  %v2981_v59 = vld [vmem:[%s3666_s10 + $0x60] sm:$0xff] }
 0x17f   : > { %2541 = vmatmul.msk.bf16.vlgmr.msra.gmra.mxu1 %vm1368_vm6, %v1350_v60  ;;  %1630 = vmatpush.bf16.msra.mxu3 %v2974_v58 }
 0x180   : > { %1570 = vmatpush.bf16.msra.mxu2 %v2981_v59 }
 0x185   : > { %2532 = vmatmul.msk.bf16.vlgmr.msra.gmra.mxu0 %vm1368_vm6, %v1350_v60  ;;  %v2973_v60 = vld [vmem:[%s3666_s10 + $0x20] sm:$0xff] }
 0x186   : > { %1631 = vmatpush.bf16.msra.mxu3 %v2973_v60 }
 0x1dc   : > { %v1203_v61 = vpop.f32.mrf.mxu1 }
 0x1e2   : > { %v1155_v39 = vpop.f32.mrf.mxu0 }
 0x1e3   : > { %v1204_v8 = vadd.f32 %v1203_v61, %v1155_v39  ;;  %v2980_v61 = vld [vmem:[%s3666_s10 + $0x58] sm:$0xff] }
 0x1e4   : > { %v1205_v62 = vpop.f32.mrf.mxu1  ;;  %v2972_v39 = vld [vmem:[%s3666_s10 + $0x18] sm:$0xff]  ;;  %1571 = vmatpush.bf16.msra.mxu2 %v2980_v61 }
 0x1e5   : > { %1632 = vmatpush.bf16.msra.mxu3 %v2972_v39  ;;  %v3009_v39 = vld [vmem:[%s3668_s12 + $0x40] sm:$0xff] }
 0x1ea   : > { %v1157_v63 = vpop.f32.mrf.mxu0 }
 0x1eb   : > { %v1206_v10 = vadd.f32 %v1205_v62, %v1157_v63  ;;  %v2990_v62 = vld [vmem:[%s3666_s10 + $0xa8] sm:$0xff] }
 0x1ec   : > { %v1208_v0 = vpop.f32.mrf.mxu1  ;;  %v2998_v63 = vld [vmem:[%s3666_s10 + $0xe8] sm:$0xff]  ;;  %1710 = vmatpush.bf16.msrb.mxu0 %v2990_v62  ;;  %v3013_v62 = vld [vmem:[%s3668_s12 + $0x60] sm:$0xff] }
 0x1ed   : > { %1791 = vmatpush.bf16.msrb.mxu1 %v2998_v63 }
 0x1f0   : > { %v1265_v1 = vpop.f32.mrf.mxu2 }
 0x1f1   : > { %v1330_v2 = vpop.f32.mrf.mxu3  ;;  %v1274_v11 = vadd.f32 %v1265_v1, %v1204_v8  ;;  %v2971_v1 = vld [vmem:[%s3666_s10 + $0x10] sm:$0xff]  ;;  %v2996_v8 = vld [vmem:[%s3666_s10 + $0xd8] sm:$0xff] }
 0x1f2   : > { %v1160_v3 = vpop.f32.mrf.mxu0  ;;  %1633 = vmatpush.bf16.msra.mxu3 %v2971_v1  ;;  %v3033_v1 = vld [vmem:[%s3668_s12 + $0x100] sm:$0xff] }
 0x1f3   : > { %v1209_v12 = vadd.f32 %v1208_v0, %v1160_v3  ;;  %v1339_v19 = vadd.f32 %v1330_v2, %v1274_v11  ;;  %v2979_v0 = vld [vmem:[%s3666_s10 + $0x50] sm:$0xff]  ;;  %v2989_v3 = vld [vmem:[%s3666_s10 + $0xa0] sm:$0xff] }
 0x1f4   : > { %v1210_v4 = vpop.f32.mrf.mxu1  ;;  %1572 = vmatpush.bf16.msra.mxu2 %v2979_v0  ;;  %1711 = vmatpush.bf16.msrb.mxu0 %v2989_v3  ;;  %v3054_v0 = vld [vmem:[%s3667_s11] ss:$0 sm:$0xff] }
 0x1f5   : > { %v1346_v28 = vadd.f32 %v3053_v20, %v1339_v19  ;;  %v2997_v4 = vld [vmem:[%s3666_s10 + $0xe0] sm:$0xff] }
 0x1f6   : > { %1792 = vmatpush.bf16.msrb.mxu1 %v2997_v4 }
 0x1f8   : > { %v1267_v5 = vpop.f32.mrf.mxu2 }
 0x1f9   : > { %v1332_v6 = vpop.f32.mrf.mxu3  ;;  %v1275_v13 = vadd.f32 %v1267_v5, %v1206_v10  ;;  %v2978_v5 = vld [vmem:[%s3666_s10 + $0x48] sm:$0xff]  ;;  %v2969_v10 = vld [vmem:[%s3666_s10] sm:$0xff] }
 0x1fa   : > { %v1162_v7 = vpop.f32.mrf.mxu0  ;;  %1573 = vmatpush.bf16.msra.mxu2 %v2978_v5  ;;  %1793 = vmatpush.bf16.msrb.mxu1 %v2996_v8 }
 0x1fb   : > { %v1340_v22 = vadd.f32 %v1332_v6, %v1275_v13  ;;  %v2970_v6 = vld [vmem:[%s3666_s10 + $0x8] sm:$0xff]  ;;  %v2988_v7 = vld [vmem:[%s3666_s10 + $0x98] sm:$0xff]  ;;  %v2995_v13 = vld [vmem:[%s3666_s10 + $0xd0] sm:$0xff] }
 0x1fc   : > { %v1411_v9 = vpop.f32.mrf.mxu1  ;;  %1634 = vmatpush.bf16.msra.mxu3 %v2970_v6  ;;  %1712 = vmatpush.bf16.msrb.mxu0 %v2988_v7 }
 0x1fd   : > { %v1412_v23 = vadd.f32 %v1411_v9, %v1389_v14  ;;  %v1347_v29 = vadd.f32 %v3053_v20, %v1340_v22  ;;  %v2977_v9 = vld [vmem:[%s3666_s10 + $0x40] sm:$0xff]  ;;  %v2986_v14 = vld [vmem:[%s3666_s10 + $0x88] sm:$0xff] }
 0x1fe   : > { %1574 = vmatpush.bf16.msra.mxu2 %v2977_v9  ;;  %1794 = vmatpush.bf16.msrb.mxu1 %v2995_v13 }
 0x1ff   : > { %v1420_v30 = vperm.slane %v1412_v23, 0 }
 0x200   : > { %v1270_v15 = vpop.f32.mrf.mxu2  ;;  %1635 = vmatpush.bf16.msra.mxu3 %v2969_v10 }
 0x201   : > { %v1335_v16 = vpop.f32.mrf.mxu3  ;;  %v1276_v18 = vadd.f32 %v1270_v15, %v1209_v12  ;;  %v2987_v12 = vld [vmem:[%s3666_s10 + $0x90] sm:$0xff]  ;;  %v2994_v15 = vld [vmem:[%s3666_s10 + $0xc8] sm:$0xff] }
 0x202   : > { %v1381_v21 = vpop.f32.mrf.mxu0  ;;  %1713 = vmatpush.bf16.msrb.mxu0 %v2987_v12  ;;  %1795 = vmatpush.bf16.msrb.mxu1 %v2994_v15  ;;  %v3028_v12 = vld [vmem:[%s3668_s12 + $0xd8] sm:$0xff] }
 0x203   : > { %v1341_v24 = vadd.f32 %v1335_v16, %v1276_v18  ;;  %v1382_v25 = vadd.f32 %v1381_v21, %v1355_v17  ;;  %v2985_v16 = vld [vmem:[%s3666_s10 + $0x80] sm:$0xff] }
 0x204   : > { %v1413_v26 = vpop.f32.mrf.mxu1  ;;  %v2993_v17 = vld [vmem:[%s3666_s10 + $0xc0] sm:$0xff] }
 0x205   : > { %v1415_v27 = vadd.f32 1.0, %v1382_v25  ;;  %v1348_v31 = vadd.f32 %v3053_v20, %v1341_v24 }
 0x206   : > { %1714 = vmatpush.bf16.msrb.mxu0 %v2986_v14  ;;  %1796 = vmatpush.bf16.msrb.mxu1 %v2993_v17  ;;  %v3032_v17 = vld [vmem:[%s3668_s12 + $0xf8] sm:$0xff] }
 0x207   : > { %v1416_v32 = vperm.slane %v1415_v27, 0 }
 0x208   : > { %v1272_v33 = vpop.f32.mrf.mxu2 }
 0x209   : > { %v1337_v34 = vpop.f32.mrf.mxu3  ;;  %v1417_v35 = vmul.f32 %v1416_v32, %v1346_v28  ;;  %v1418_v36 = vmul.f32 %v1416_v32, %v1347_v29  ;;  %v1419_v37 = vmul.f32 %v1416_v32, %v1348_v31  ;;  %v3008_v31 = vld [vmem:[%s3668_s12 + $0x38] sm:$0xff] }
 0x20a   : > { %v1383_v38 = vpop.f32.mrf.mxu0  ;;  %1715 = vmatpush.bf16.msrb.mxu0 %v2985_v16  ;;  %v3004_v32 = vld [vmem:[%s3668_s12 + $0x18] sm:$0xff]  ;;  %1866 = vmatpush.bf16.msrb.mxu2 %v3008_v31 }
 0x20b   : > { %v1421_v40 = vadd.f32 %v1420_v30, %v1417_v35  ;;  %v1422_v41 = vadd.f32 %v1420_v30, %v1418_v36  ;;  %v1423_v42 = vadd.f32 %v1420_v30, %v1419_v37  ;;  %v3020_v33 = vld [vmem:[%s3668_s12 + $0x98] sm:$0xff]  ;;  %1906 = vmatpush.bf16.msrb.mxu3 %v3004_v32  ;;  %v3007_v35 = vld [vmem:[%s3668_s12 + $0x30] sm:$0xff] }
 0x20c   : > { %v3024_v34 = vld [vmem:[%s3668_s12 + $0xb8] sm:$0xff]  ;;  %v3003_v36 = vld [vmem:[%s3668_s12 + $0x10] sm:$0xff] }
 0x20d   : > { %v1425_v43 = vmul.f32 0.2, %v1422_v41  ;;  %v1424_v44 = vmul.f32 0.2, %v1421_v40  ;;  %v1426_v45 = vmul.f32 0.2, %v1423_v42  ;;  %2113 = vmatpush.bf16.msra.mxu1 %v3024_v34 }
 0x20e   : > { %2061 = vmatpush.bf16.msra.mxu0 %v3020_v33  ;;  %v3019_v37 = vld [vmem:[%s3668_s12 + $0x90] sm:$0xff]  ;;  %1867 = vmatpush.bf16.msrb.mxu2 %v3007_v35 }
 0x20f   : > { %v1428_v46 = vmax.f32 %v1422_v41, %v1425_v43  ;;  %v1427_v47 = vmax.f32 %v1421_v40, %v1424_v44  ;;  %v1429_v48 = vmax.f32 %v1423_v42, %v1426_v45  ;;  %v3023_v38 = vld [vmem:[%s3668_s12 + $0xb0] sm:$0xff]  ;;  %1907 = vmatpush.bf16.msrb.mxu3 %v3003_v36  ;;  %v3006_v40 = vld [vmem:[%s3668_s12 + $0x28] sm:$0xff]  ;;  %v3005_v44 = vld [vmem:[%s3668_s12 + $0x20] sm:$0xff] }
 0x210   : > { %v3002_v41 = vld [vmem:[%s3668_s12 + $0x8] sm:$0xff]  ;;  %v3001_v45 = vld [vmem:[%s3668_s12] sm:$0xff] }
 0x211   : > { %1461 = vrot.lane.b32.xlu2 %v1428_v46, %s3071_s22  ;;  %1436 = vrot.lane.b32.xlu1 %v1427_v47, %s3071_s22  ;;  %1481 = vst.msk [vmem:[#allocation3 + $0x6] sm:$0x4] %vm1480_vm7, %v1429_v48  ;;  %v3018_v42 = vld [vmem:[%s3668_s12 + $0x88] sm:$0xff]  ;;  %s2353_s22 = sshll.u32 %s3672_s30, 3 }
 0x212   : > { %1445 = vrot.lane.b32.xlu0 %v1427_v47, %s3069_s24  ;;  %1455 = vst.msk [vmem:[#allocation3 + $0x5] sm:$0x1] %vm1454_vm8, %v1428_v46  ;;  %2062 = vmatpush.bf16.msra.mxu0 %v3019_v37  ;;  %v3022_v43 = vld [vmem:[%s3668_s12 + $0xa8] sm:$0xff]  ;;  %s479_s28 = scalar_lea.vmem %s3670_s14, %s2353_s22 }
 0x213   : > { %1473 = vst.msk [vmem:[#allocation3 + $0x7] sm:$0x1] %vm1454_vm8, %v1429_v48  ;;  %2114 = vmatpush.bf16.msra.mxu1 %v3023_v38  ;;  %1868 = vmatpush.bf16.msrb.mxu2 %v3006_v40 }
 0x214   : > { %1451 = vst.msk [vmem:[#allocation3 - $0x2] sm:$0x40] %vm1450_vm9, %v1427_v47  ;;  %1908 = vmatpush.bf16.msrb.mxu3 %v3002_v41 }
 0x216   : > { %2063 = vmatpush.bf16.msra.mxu0 %v3018_v42 }
 0x217   : > { %2115 = vmatpush.bf16.msra.mxu1 %v3022_v43  ;;  %1869 = vmatpush.bf16.msrb.mxu2 %v3005_v44 }
 0x218   : > { %1909 = vmatpush.bf16.msrb.mxu3 %v3001_v45 }
 0x219   : > { %1469 = vrot.lane.b32.xlu2 %v1428_v46, %s3069_s24  ;;  %1457 = vrot.lane.b32.xlu1 %v1428_v46, %s3072_s23  ;;  %v3017_v46 = vld [vmem:[%s3668_s12 + $0x80] sm:$0xff] }
 0x21a   : > { %1431 = vrot.lane.b32.xlu0 %v1427_v47, %s3072_s23  ;;  %v3021_v47 = vld [vmem:[%s3668_s12 + $0xa0] sm:$0xff]  ;;  %2064 = vmatpush.bf16.msra.mxu0 %v3017_v46 }
 0x21b   : > { %2116 = vmatpush.bf16.msra.mxu1 %v3021_v47 }
 0x222   : > { %1475 = vrot.lane.b32.xlu0 %v1429_v48, %s3069_s24  ;;  %v3012_v48 = vld [vmem:[%s3668_s12 + $0x58] sm:$0xff] }
 0x26b   : > { %v1462_v2 = vpop.permute.xlu2 %1461 }
 0x26c   : > { %1468 = vst.msk [vmem:[#allocation3] sm:$0x20] %vm1467_vm10, %v1462_v2 }
 0x273   : > { %v1470_v11 = vpop.permute.xlu2 %1469 }
 0x274   : > { %1472 = vst.msk [vmem:[#allocation3 - $0x1] sm:$0x80] %vm1452_vm11, %v1470_v11 }
 0x283   : > { %v1437_v18 = vpop.permute.xlu1 %1436 }
 0x284   : > { %1440 = vst.msk [vmem:[#allocation3] sm:$0x2] %vm1439_vm12, %v1437_v18  ;;  %v1446_v19 = vpop.permute.xlu0 %1445 }
 0x285   : > { %1444 = vst.msk [vmem:[#allocation3 - $0x1] sm:$0x8] %vm1443_vm13, %v1437_v18 }
 0x286   : > { %1449 = vst.msk [vmem:[#allocation3 - $0x2] sm:$0x20] %vm1448_vm14, %v1446_v19 }
 0x287   : > { %1453 = vst.msk [vmem:[#allocation3 - $0x3] sm:$0x80] %vm1452_vm11, %v1446_v19 }
 0x288   : > { %1464 = vst.msk [vmem:[#allocation3 + $0x1] sm:$0x8] %vm1443_vm13, %v1462_v2 }
 0x28b   : > { %v1458_v20 = vpop.permute.xlu1 %1457 }
 0x28c   : > { %1460 = vst.msk [vmem:[#allocation3 + $0x1] sm:$0x4] %vm1441_vm15, %v1458_v20  ;;  %v1432_v21 = vpop.permute.xlu0 %1431 }
 0x28d   : > { %1466 = vst.msk [vmem:[#allocation3] sm:$0x10] %vm1465_vm0, %v1458_v20  ;;  %v3027_v20 = vld [vmem:[%s3668_s12 + $0xd0] sm:$0xff] }
 0x28e   : > { %1435 = vst.msk [vmem:[#allocation3] sm:$0x1] %vm1434_vm1, %v1432_v21 }
 0x28f   : > { %1442 = vst.msk [vmem:[#allocation3 - $0x1] sm:$0x4] %vm1441_vm15, %v1432_v21  ;;  %v3031_v21 = vld [vmem:[%s3668_s12 + $0xf0] sm:$0xff] }
 0x294   : > { %v1476_v22 = vpop.permute.xlu0 %1475 }
 0x295   : > { %1479 = vst.msk [vmem:[#allocation3 + $0x6] sm:$0x2] %vm1478_vm2, %v1476_v22  ;;  %v3026_v22 = vld [vmem:[%s3668_s12 + $0xc8] sm:$0xff] }
 0x296   : > { %v1500_v23 = vld [vmem:[#allocation3 + $0x1] sm:$0x3f] }
 0x297   : > { %v1482_v24 = vld [vmem:[#allocation3] sm:$0x3f]  ;;  %v1501_v25 = vpack.c.bf16 %v1500_v23, %v1500_v23  ;;  %v3030_v23 = vld [vmem:[%s3668_s12 + $0xe8] sm:$0xff] }
 0x298   : > { %v1483_v26 = vpack.c.bf16 %v1482_v24, %v1482_v24  ;;  %v3025_v24 = vld [vmem:[%s3668_s12 + $0xc0] sm:$0xff] }
 0x299   : > { %1575 = vmatmul.bf16.vlgmr.msra.gmra.mxu2 %v1501_v25  ;;  %v3029_v25 = vld [vmem:[%s3668_s12 + $0xe0] sm:$0xff] }
 0x29a   : > { %1636 = vmatmul.bf16.vlgmr.msra.gmra.mxu3 %v1483_v26  ;;  %1957 = vmatpush.bf16.msra.mxu2 %v3012_v48 }
 0x29b   : > { %2009 = vmatpush.bf16.msra.mxu3 %v3016_v49 }
 0x29c   : > { %v1641_v27 = vld [vmem:[#allocation3 + $0x3] sm:$0x3f] }
 0x29d   : > { %v1722_v28 = vld [vmem:[#allocation3 + $0x4] sm:$0x3f]  ;;  %v1642_v29 = vpack.c.bf16 %v1641_v27, %v1641_v27 }
 0x29e   : > { %v1723_v30 = vpack.c.bf16 %v1722_v28, %v1722_v28  ;;  %1958 = vmatpush.bf16.msra.mxu2 %v3011_v51 }
 0x29f   : > { %1716 = vmatmul.bf16.vlgmr.msrb.gmra.mxu0 %v1642_v29  ;;  %2010 = vmatpush.bf16.msra.mxu3 %v3015_v52 }
 0x2a0   : > { %1797 = vmatmul.bf16.vlgmr.msrb.gmra.mxu1 %v1723_v30  ;;  %2269 = vmatpush.bf16.msrb.mxu0 %v3036_v50 }
 0x2a2   : > { %1959 = vmatpush.bf16.msra.mxu2 %v3010_v54 }
 0x2a3   : > { %2011 = vmatpush.bf16.msra.mxu3 %v3014_v55 }
 0x2a4   : > { %2270 = vmatpush.bf16.msrb.mxu0 %v3035_v53 }
 0x2a6   : > { %1960 = vmatpush.bf16.msra.mxu2 %v3009_v39 }
 0x2a7   : > { %2012 = vmatpush.bf16.msra.mxu3 %v3013_v62 }
 0x2a8   : > { %2271 = vmatpush.bf16.msrb.mxu0 %v3034_v56 }
 0x2ac   : > { %2272 = vmatpush.bf16.msrb.mxu0 %v3033_v1 }
 0x31c   : > { %v1576_v57 = vpop.f32.mrf.mxu2  ;;  %v1717_v60 = vpop.f32.mrf.mxu0 }
 0x31d   : > { %v1637_v58 = vpop.f32.mrf.mxu3  ;;  %v1798_v61 = vpop.f32.mrf.mxu1 }
 0x31e   : > { %v1638_v59 = vadd.f32 %v1637_v58, %v1576_v57 }
 0x320   : > { %v1721_v63 = vadd.f32 %v1717_v60, %v1638_v59  ;;  %v3055_v60 = vld [vmem:[%s3669_s13] ss:$0 sm:$0xff] }
 0x322   : > { %v1802_v2 = vadd.f32 %v1798_v61, %v1721_v63 }
 0x324   : > { %v1807_v3 = vadd.f32 %v3054_v0, %v1802_v2  ;;  %v1578_v4 = vpop.f32.mrf.mxu2  ;;  %v1719_v7 = vpop.f32.mrf.mxu0 }
 0x325   : > { %v1639_v5 = vpop.f32.mrf.mxu3  ;;  %v1800_v8 = vpop.f32.mrf.mxu1 }
 0x326   : > { %v1808_v6 = vmul.f32 0.2, %v1807_v3 }
 0x328   : > { %v1809_v9 = vmax.f32 %v1807_v3, %v1808_v6 }
 0x32a   : > { %1811 = vst.msk [vmem:[#allocation4 + $0x5] sm:$0x3] %vm1810_vm3, %v1809_v9 }
 0x32b   : > { %1813 = vst.msk [vmem:[#allocation4 + $0x6] sm:$0x18] %vm1812_vm5, %v1809_v9 }
 0x331   : > { %v1824_v10 = vld [vmem:[#allocation4 + $0x1] sm:$0xff] }
 0x332   : > { %v1814_v11 = vld [vmem:[#allocation4] sm:$0xff]  ;;  %v1825_v13 = vpack.c.bf16 %v1824_v10, %v1824_v10  ;;  %v2227_v28 = vld [vmem:[#allocation4 + $0xa] sm:$0xff] }
 0x333   : > { %v1815_v14 = vpack.c.bf16 %v1814_v11, %v1814_v11  ;;  %v2019_v15 = vld [vmem:[#allocation4 + $0x5] sm:$0xff]  ;;  %v2228_v31 = vpack.c.bf16 %v2227_v28, %v2227_v28 }
 0x334   : > { %v2071_v16 = vld [vmem:[#allocation4 + $0x6] sm:$0xff]  ;;  %v2020_v18 = vpack.c.bf16 %v2019_v15, %v2019_v15  ;;  %2742 = vmatmul.msk.bf16.vlgmr.msrb.gmra.mxu2 %vm481_vm4, %v1825_v13 }
 0x335   : > { %v2072_v19 = vpack.c.bf16 %v2071_v16, %v2071_v16  ;;  %2759 = vmatmul.msk.bf16.vlgmr.msrb.gmra.mxu3 %vm481_vm4, %v1815_v14  ;;  %2165 = vmatpush.bf16.msrb.mxu2 %v3028_v12  ;;  %v1915_v26 = vld [vmem:[#allocation4 + $0x2] sm:$0xff] }
 0x336   : > { %2834 = vmatmul.msk.bf16.vlgmr.msra.gmra.mxu0 %vm481_vm4, %v2020_v18  ;;  %2217 = vmatpush.bf16.msrb.mxu3 %v3032_v17  ;;  %v1967_v27 = vld [vmem:[#allocation4 + $0x4] sm:$0xff]  ;;  %v1916_v29 = vpack.c.bf16 %v1915_v26, %v1915_v26 }
 0x337   : > { %2859 = vmatmul.msk.bf16.vlgmr.msra.gmra.mxu1 %vm481_vm4, %v2072_v19  ;;  %v1968_v30 = vpack.c.bf16 %v1967_v27, %v1967_v27  ;;  %v2123_v32 = vld [vmem:[#allocation4 + $0x8] sm:$0xff] }
 0x338   : > { %v2175_v33 = vld [vmem:[#allocation4 + $0x9] sm:$0xff]  ;;  %v2124_v34 = vpack.c.bf16 %v2123_v32, %v2123_v32 }
 0x339   : > { %2166 = vmatpush.bf16.msrb.mxu2 %v3027_v20  ;;  %v2176_v35 = vpack.c.bf16 %v2175_v33, %v2175_v33 }
 0x33a   : > { %2218 = vmatpush.bf16.msrb.mxu3 %v3031_v21 }
 0x33d   : > { %2167 = vmatpush.bf16.msrb.mxu2 %v3026_v22 }
 0x33e   : > { %2219 = vmatpush.bf16.msrb.mxu3 %v3030_v23 }
 0x341   : > { %2168 = vmatpush.bf16.msrb.mxu2 %v3025_v24 }
 0x342   : > { %2220 = vmatpush.bf16.msrb.mxu3 %v3029_v25 }
 0x344   : > { %2784 = vmatmul.msk.bf16.vlgmr.msra.gmra.mxu2 %vm481_vm4, %v1916_v29 }
 0x345   : > { %2809 = vmatmul.msk.bf16.vlgmr.msra.gmra.mxu3 %vm481_vm4, %v1968_v30 }
 0x346   : > { %2934 = vmatmul.msk.bf16.vlgmr.msrb.gmra.mxu0 %vm481_vm4, %v2228_v31 }
 0x354   : > { %2884 = vmatmul.msk.bf16.vlgmr.msrb.gmra.mxu2 %vm481_vm4, %v2124_v34 }
 0x355   : > { %2909 = vmatmul.msk.bf16.vlgmr.msrb.gmra.mxu3 %vm481_vm4, %v2176_v35 }
 0x3b3   : > { %v2066_v36 = vpop.f32.mrf.mxu0 }
 0x3b4   : > { %v2118_v37 = vpop.f32.mrf.mxu1 }
 0x3b7   : > { %v1871_v38 = vpop.f32.mrf.mxu2 }
 0x3b8   : > { %v1911_v40 = vpop.f32.mrf.mxu3 }
 0x3b9   : > { %v1912_v48 = vadd.f32 %v1911_v40, %v1871_v38 }
 0x3bb   : > { %v2068_v41 = vpop.f32.mrf.mxu0 }
 0x3bc   : > { %v2120_v42 = vpop.f32.mrf.mxu1 }
 0x3bf   : > { %v1873_v43 = vpop.f32.mrf.mxu2 }
 0x3c0   : > { %v1913_v44 = vpop.f32.mrf.mxu3 }
 0x3c3   : > { %v2274_v45 = vpop.f32.mrf.mxu0 }
 0x3c7   : > { %v1962_v46 = vpop.f32.mrf.mxu2 }
 0x3c8   : > { %v2014_v47 = vpop.f32.mrf.mxu3  ;;  %v1966_v49 = vadd.f32 %v1962_v46, %v1912_v48 }
 0x3ca   : > { %v2018_v51 = vadd.f32 %v2014_v47, %v1966_v49 }
 0x3cb   : > { %v2276_v50 = vpop.f32.mrf.mxu0 }
 0x3cc   : > { %v2070_v54 = vadd.f32 %v2066_v36, %v2018_v51 }
 0x3ce   : > { %v2122_v55 = vadd.f32 %v2118_v37, %v2070_v54 }
 0x3cf   : > { %v1964_v52 = vpop.f32.mrf.mxu2 }
 0x3d0   : > { %v2016_v53 = vpop.f32.mrf.mxu3 }
 0x3d7   : > { %v2170_v56 = vpop.f32.mrf.mxu2 }
 0x3d8   : > { %v2222_v57 = vpop.f32.mrf.mxu3  ;;  %v2174_v58 = vadd.f32 %v2170_v56, %v2122_v55 }
 0x3da   : > { %v2226_v59 = vadd.f32 %v2222_v57, %v2174_v58 }
 0x3dc   : > { %v2278_v61 = vadd.f32 %v2274_v45, %v2226_v59 }
 0x3de   : > { %v2283_v39 = vadd.f32 %v3055_v60, %v2278_v61 }
 0x3df   : > { %v2172_v62 = vpop.f32.mrf.mxu2 }
 0x3e0   : > { %v2224_v63 = vpop.f32.mrf.mxu3  ;;  %2284 = vst [vmem:[%s479_s28] sm:$0xff] %v2283_v39 }
 0x3e1 PF: > { %s24_s29 = sadd.s32 1, %s3065_s29  }
 0x3e2   : > { %p21_p4 = scmp.ge.s32.totalorder %s24_s29, 4  }
 0x3e4   :  { %23 = sbr.rel (!%p21_p4) target bundleno = 1 (0x1), region = 126 }

</bundles_post_ra>
